<compile_context>
chip_gen: v6e
topology: v6e:2x2x1
jax: 0.10.0
libtpu: 0.0.40
codegen_flags: <defaults>
</compile_context>

<pallas_src>
import jax
import jax.numpy as jnp
from jax.experimental import pallas as pl
from jax.experimental.pallas import tpu as pltpu


def _make_textcnn_kernel(S, E, kernel_sizes):
    max_k = max(kernel_sizes)

    def windowed_means(x_bf16):
        # x_bf16: (tb, S, E).  Returns a list of (tb, E) f32 windowed means,
        # one per (conv, tap) pair, using one full reduction over S plus
        # up to (max_k - 1) edge-row corrections at each end.
        xf = x_bf16.astype(jnp.float32)
        full = jnp.sum(xf, axis=1)                      # (tb, E)
        zero = jnp.zeros_like(full)
        prefix = [zero]                                 # prefix[j] = sum of first j rows
        suffix = [zero]                                 # suffix[j] = sum of last  j rows
        for j in range(1, max_k):
            prefix.append(prefix[-1] + xf[:, j - 1, :])
            suffix.append(suffix[-1] + xf[:, S - j, :])
        means = []
        for k in kernel_sizes:
            l_out = S - k + 1
            inv = 1.0 / float(l_out)
            for t in range(k):
                # window [t, t + l_out): drop first t rows and last (k-1-t) rows
                means.append((full - prefix[t] - suffix[k - 1 - t]) * inv)
        return means

    def kernel(emb_ref, cemb_ref, wconv_ref, bconv_ref, wdec_ref, bdec_ref, out_ref):
        me = windowed_means(emb_ref[...])               # per-(conv, tap), emb half
        mc = windowed_means(cemb_ref[...])              # per-(conv, tap), cemb half
        pieces = []
        for a, c in zip(me, mc):                        # channel order matches
            pieces.append(a)                            # x_cat = [emb | cemb]
            pieces.append(c)
        m = jnp.concatenate(pieces, axis=-1).astype(jnp.bfloat16)   # (tb, sum(k)*2E)

        # All conv branches + pool + bias in one lane-dense MXU matmul.
        h = jnp.dot(m, wconv_ref[...], preferred_element_type=jnp.float32)
        h = jnp.maximum(h + bconv_ref[...], 0.0)        # (tb, C_PAD), ReLU

        # Dropout(0.5) is the identity in inference mode.
        o = jnp.dot(h.astype(jnp.bfloat16), wdec_ref[...],
                    preferred_element_type=jnp.float32) + bdec_ref[...]
        out_ref[...] = o                                # (tb, OUT_PAD) lane-dense store

    return kernel


def textcnn_forward(tokens, params, kernel_sizes, num_channels):
    E = params["embedding"].shape[1]
    two_e = 2 * E

    # Embedding gathers are glue: plain JAX.  emb/cemb passed separately so the
    # concatenated activation never hits HBM; activations in bf16.
    emb = jnp.take(params["embedding"], tokens, axis=0).astype(jnp.bfloat16)          # (B,S,E)
    cemb = jnp.take(params["constant_embedding"], tokens, axis=0).astype(jnp.bfloat16)  # (B,S,E)
    B, S, _ = emb.shape

    C_total = sum(num_channels)
    C_PAD = ((C_total + 127) // 128) * 128          # lane-dense hidden slab
    OUT_PAD = 128                                   # lane-dense decoder output slab
    K_total = sum(kernel_sizes) * two_e

    # ---- Host-side weight relayout (done once, outside the kernel) ----------
    # Per-conv (C, 2E, k) -> (k*2E, C), stacked block-structured into one
    # (K_total, C_PAD) slab so the kernel never slices/transposes weights.
    wconv = jnp.zeros((K_total, C_PAD), jnp.float32)
    bconv = jnp.zeros((1, C_PAD), jnp.float32)
    r_off, c_off = 0, 0
    for i, (k, c) in enumerate(zip(kernel_sizes, num_channels)):
        wi = jnp.transpose(params[f"conv{i}_w"], (2, 1, 0)).reshape(k * two_e, c)
        wconv = wconv.at[r_off:r_off + k * two_e, c_off:c_off + c].set(wi)
        bconv = bconv.at[0, c_off:c_off + c].set(params[f"conv{i}_b"][0])
        r_off += k * two_e
        c_off += c
    wdec = jnp.zeros((C_PAD, OUT_PAD), jnp.float32)
    wdec = wdec.at[:C_total, :2].set(params["dec_w"].T)
    bdec = jnp.zeros((1, OUT_PAD), jnp.float32)
    bdec = bdec.at[0, :2].set(params["dec_b"][0])

    wconv = wconv.astype(jnp.bfloat16)
    wdec = wdec.astype(jnp.bfloat16)

    # ---- Batch grid -----------------------------------------------------------
    tb = 8 if (B >= 8 and B % 8 == 0) else B
    grid = (B // tb,)

    kernel = _make_textcnn_kernel(S, E, kernel_sizes)

    grid_spec = pltpu.PrefetchScalarGridSpec(
        num_scalar_prefetch=0,
        grid=grid,
        in_specs=[
            pl.BlockSpec((tb, S, E), lambda b: (b, 0, 0)),         # emb
            pl.BlockSpec((tb, S, E), lambda b: (b, 0, 0)),         # cemb
            pl.BlockSpec((K_total, C_PAD), lambda b: (0, 0)),      # fused conv weight
            pl.BlockSpec((1, C_PAD), lambda b: (0, 0)),            # fused conv bias
            pl.BlockSpec((C_PAD, OUT_PAD), lambda b: (0, 0)),      # decoder weight
            pl.BlockSpec((1, OUT_PAD), lambda b: (0, 0)),          # decoder bias
        ],
        out_specs=pl.BlockSpec((tb, OUT_PAD), lambda b: (b, 0)),
    )

    out = pl.pallas_call(
        kernel,
        out_shape=jax.ShapeDtypeStruct((B, OUT_PAD), jnp.float32),
        grid_spec=grid_spec,
        compiler_params=pltpu.CompilerParams(
            dimension_semantics=("parallel",),
            vmem_limit_bytes=32 * 1024 * 1024),
    )(emb, cemb, wconv, bconv, wdec, bdec)

    return out[:, :2]


def reference_forward(tokens, params, kernel_sizes, num_channels):
    """Pure-JAX (f32) reference mirroring the PyTorch forward exactly."""
    emb = jnp.take(params["embedding"], tokens, axis=0)
    cemb = jnp.take(params["constant_embedding"], tokens, axis=0)
    x = jnp.concatenate([emb, cemb], axis=2)                 # (B, S, 2E)
    x_ncw = jnp.transpose(x, (0, 2, 1))                      # (B, 2E, S)  NCW
    feats = []
    for i, (k, c) in enumerate(zip(kernel_sizes, num_channels)):
        w = params[f"conv{i}_w"]                             # (C, 2E, k)
        b = params[f"conv{i}_b"][0]                          # (C,)
        y = jax.lax.conv_general_dilated(
            x_ncw, w, window_strides=(1,), padding="VALID",
            dimension_numbers=("NCH", "OIH", "NCH"))
        y = y + b[None, :, None]
        pooled = jnp.mean(y, axis=2)                         # AdaptiveAvgPool1d(1)
        feats.append(jnp.maximum(pooled, 0.0))               # ReLU then squeeze
    enc = jnp.concatenate(feats, axis=1)
    return enc @ params["dec_w"].T + params["dec_b"][0]


def init_params(key, vocab_size, embed_size, kernel_sizes, num_channels):
    keys = jax.random.split(key, 4 + 2 * len(kernel_sizes))
    two_e = 2 * embed_size
    params = {
        "embedding": 0.1 * jax.random.normal(keys[0], (vocab_size, embed_size), jnp.float32),
        "constant_embedding": 0.1 * jax.random.normal(keys[1], (vocab_size, embed_size), jnp.float32),
        "dec_w": 0.1 * jax.random.normal(keys[2], (2, sum(num_channels)), jnp.float32),
        "dec_b": 0.1 * jax.random.normal(keys[3], (1, 2), jnp.float32),
    }
    for i, (c, k) in enumerate(zip(num_channels, kernel_sizes)):
        params[f"conv{i}_w"] = 0.1 * jax.random.normal(
            keys[4 + 2 * i], (c, two_e, k), jnp.float32)
        params[f"conv{i}_b"] = 0.1 * jax.random.normal(
            keys[5 + 2 * i], (1, c), jnp.float32)
    return params


if __name__ == "__main__":
    vocab_size = 50
    embed_size = 8            # 2E = 16 conv input channels
    seq_len = 16
    batch = 16                # tb = 8 -> grid = (2,), parallel over batch
    kernel_sizes = (3, 4, 5)
    num_channels = (4, 8, 16)

    key = jax.random.PRNGKey(0)
    pkey, tkey = jax.random.split(key)
    params = init_params(pkey, vocab_size, embed_size, kernel_sizes, num_channels)
    tokens = jax.random.randint(tkey, (batch, seq_len), 0, vocab_size, dtype=jnp.int32)

    out = textcnn_forward(tokens, params, kernel_sizes, num_channels)
    out = jax.block_until_ready(out)

    ref = reference_forward(tokens, params, kernel_sizes, num_channels)
    assert out.shape == (batch, 2)
    # bf16 activations/weights with f32 accumulation -> loosened tolerance.
    assert jnp.allclose(out, ref, atol=5e-3, rtol=5e-3), (out, ref)

    print("KERNEL_OK")
</pallas_src>

<mosaic_0001>
module attributes {stable_mosaic.version = 11 : i64} {
  func.func @kernel(%arg0: i32, %arg1: memref<8x16x8xbf16, #tpu.memory_space<vmem>>, %arg2: memref<8x16x8xbf16, #tpu.memory_space<vmem>>, %arg3: memref<192x128xbf16, #tpu.memory_space<vmem>>, %arg4: memref<1x128xf32, #tpu.memory_space<vmem>>, %arg5: memref<128x128xbf16, #tpu.memory_space<vmem>>, %arg6: memref<1x128xf32, #tpu.memory_space<vmem>>, %arg7: memref<8x128xf32, #tpu.memory_space<vmem>>) attributes {dimension_semantics = [#tpu.dimension_semantics<parallel>], iteration_bounds = array<i64: 2>, scalar_prefetch = 0 : i64, scratch_operands = 0 : i64, tpu.core_type = #tpu.core_type<tc>, window_params = [{transform_indices = @transform_0, window_bounds = array<i64: 8, 16, 8>}, {transform_indices = @transform_1, window_bounds = array<i64: 8, 16, 8>}, {pipeline_mode = #tpu.pipeline_mode<synchronous>, transform_indices = @transform_2, window_bounds = array<i64: 192, 128>}, {pipeline_mode = #tpu.pipeline_mode<synchronous>, transform_indices = @transform_3, window_bounds = array<i64: 1, 128>}, {pipeline_mode = #tpu.pipeline_mode<synchronous>, transform_indices = @transform_4, window_bounds = array<i64: 128, 128>}, {pipeline_mode = #tpu.pipeline_mode<synchronous>, transform_indices = @transform_5, window_bounds = array<i64: 1, 128>}, {transform_indices = @transform_6, window_bounds = array<i64: 8, 128>}]} {
    %c0 = arith.constant 0 : index
    %c0_0 = arith.constant 0 : index
    %c0_1 = arith.constant 0 : index
    %0 = vector.load %arg1[%c0, %c0_0, %c0_1] : memref<8x16x8xbf16, #tpu.memory_space<vmem>>, vector<8x16x8xbf16>
    %1 = arith.extf %0 : vector<8x16x8xbf16> to vector<8x16x8xf32>
    %cst = arith.constant dense<0.000000e+00> : vector<8x8xf32>
    %2 = vector.multi_reduction <add>, %1, %cst [1] : vector<8x16x8xf32> to vector<8x8xf32>
    %cst_2 = arith.constant 0.000000e+00 : f32
    %3 = vector.broadcast %cst_2 : f32 to vector<8x8xf32>
    %4 = vector.extract_strided_slice %1 {offsets = [0, 0, 0], sizes = [8, 1, 8], strides = [1, 1, 1]} : vector<8x16x8xf32> to vector<8x1x8xf32>
    %5 = vector.shape_cast %4 : vector<8x1x8xf32> to vector<8x8xf32>
    %6 = arith.addf %3, %5 : vector<8x8xf32>
    %7 = vector.extract_strided_slice %1 {offsets = [0, 15, 0], sizes = [8, 1, 8], strides = [1, 1, 1]} : vector<8x16x8xf32> to vector<8x1x8xf32>
    %8 = vector.shape_cast %7 : vector<8x1x8xf32> to vector<8x8xf32>
    %9 = arith.addf %3, %8 : vector<8x8xf32>
    %10 = vector.extract_strided_slice %1 {offsets = [0, 1, 0], sizes = [8, 1, 8], strides = [1, 1, 1]} : vector<8x16x8xf32> to vector<8x1x8xf32>
    %11 = vector.shape_cast %10 : vector<8x1x8xf32> to vector<8x8xf32>
    %12 = arith.addf %6, %11 : vector<8x8xf32>
    %13 = vector.extract_strided_slice %1 {offsets = [0, 14, 0], sizes = [8, 1, 8], strides = [1, 1, 1]} : vector<8x16x8xf32> to vector<8x1x8xf32>
    %14 = vector.shape_cast %13 : vector<8x1x8xf32> to vector<8x8xf32>
    %15 = arith.addf %9, %14 : vector<8x8xf32>
    %16 = vector.extract_strided_slice %1 {offsets = [0, 2, 0], sizes = [8, 1, 8], strides = [1, 1, 1]} : vector<8x16x8xf32> to vector<8x1x8xf32>
    %17 = vector.shape_cast %16 : vector<8x1x8xf32> to vector<8x8xf32>
    %18 = arith.addf %12, %17 : vector<8x8xf32>
    %19 = vector.extract_strided_slice %1 {offsets = [0, 13, 0], sizes = [8, 1, 8], strides = [1, 1, 1]} : vector<8x16x8xf32> to vector<8x1x8xf32>
    %20 = vector.shape_cast %19 : vector<8x1x8xf32> to vector<8x8xf32>
    %21 = arith.addf %15, %20 : vector<8x8xf32>
    %22 = vector.extract_strided_slice %1 {offsets = [0, 3, 0], sizes = [8, 1, 8], strides = [1, 1, 1]} : vector<8x16x8xf32> to vector<8x1x8xf32>
    %23 = vector.shape_cast %22 : vector<8x1x8xf32> to vector<8x8xf32>
    %24 = arith.addf %18, %23 : vector<8x8xf32>
    %25 = vector.extract_strided_slice %1 {offsets = [0, 12, 0], sizes = [8, 1, 8], strides = [1, 1, 1]} : vector<8x16x8xf32> to vector<8x1x8xf32>
    %26 = vector.shape_cast %25 : vector<8x1x8xf32> to vector<8x8xf32>
    %27 = arith.addf %21, %26 : vector<8x8xf32>
    %28 = arith.subf %2, %3 : vector<8x8xf32>
    %29 = arith.subf %28, %15 : vector<8x8xf32>
    %cst_3 = arith.constant 0.0714285746 : f32
    %30 = vector.broadcast %cst_3 : f32 to vector<8x8xf32>
    %31 = arith.mulf %29, %30 : vector<8x8xf32>
    %32 = arith.subf %2, %6 : vector<8x8xf32>
    %33 = arith.subf %32, %9 : vector<8x8xf32>
    %cst_4 = arith.constant 0.0714285746 : f32
    %34 = vector.broadcast %cst_4 : f32 to vector<8x8xf32>
    %35 = arith.mulf %33, %34 : vector<8x8xf32>
    %36 = arith.subf %2, %12 : vector<8x8xf32>
    %37 = arith.subf %36, %3 : vector<8x8xf32>
    %cst_5 = arith.constant 0.0714285746 : f32
    %38 = vector.broadcast %cst_5 : f32 to vector<8x8xf32>
    %39 = arith.mulf %37, %38 : vector<8x8xf32>
    %40 = arith.subf %2, %3 : vector<8x8xf32>
    %41 = arith.subf %40, %21 : vector<8x8xf32>
    %cst_6 = arith.constant 0.0769230798 : f32
    %42 = vector.broadcast %cst_6 : f32 to vector<8x8xf32>
    %43 = arith.mulf %41, %42 : vector<8x8xf32>
    %44 = arith.subf %2, %6 : vector<8x8xf32>
    %45 = arith.subf %44, %15 : vector<8x8xf32>
    %cst_7 = arith.constant 0.0769230798 : f32
    %46 = vector.broadcast %cst_7 : f32 to vector<8x8xf32>
    %47 = arith.mulf %45, %46 : vector<8x8xf32>
    %48 = arith.subf %2, %12 : vector<8x8xf32>
    %49 = arith.subf %48, %9 : vector<8x8xf32>
    %cst_8 = arith.constant 0.0769230798 : f32
    %50 = vector.broadcast %cst_8 : f32 to vector<8x8xf32>
    %51 = arith.mulf %49, %50 : vector<8x8xf32>
    %52 = arith.subf %2, %18 : vector<8x8xf32>
    %53 = arith.subf %52, %3 : vector<8x8xf32>
    %cst_9 = arith.constant 0.0769230798 : f32
    %54 = vector.broadcast %cst_9 : f32 to vector<8x8xf32>
    %55 = arith.mulf %53, %54 : vector<8x8xf32>
    %56 = arith.subf %2, %3 : vector<8x8xf32>
    %57 = arith.subf %56, %27 : vector<8x8xf32>
    %cst_10 = arith.constant 0.0833333358 : f32
    %58 = vector.broadcast %cst_10 : f32 to vector<8x8xf32>
    %59 = arith.mulf %57, %58 : vector<8x8xf32>
    %60 = arith.subf %2, %6 : vector<8x8xf32>
    %61 = arith.subf %60, %21 : vector<8x8xf32>
    %cst_11 = arith.constant 0.0833333358 : f32
    %62 = vector.broadcast %cst_11 : f32 to vector<8x8xf32>
    %63 = arith.mulf %61, %62 : vector<8x8xf32>
    %64 = arith.subf %2, %12 : vector<8x8xf32>
    %65 = arith.subf %64, %15 : vector<8x8xf32>
    %cst_12 = arith.constant 0.0833333358 : f32
    %66 = vector.broadcast %cst_12 : f32 to vector<8x8xf32>
    %67 = arith.mulf %65, %66 : vector<8x8xf32>
    %68 = arith.subf %2, %18 : vector<8x8xf32>
    %69 = arith.subf %68, %9 : vector<8x8xf32>
    %cst_13 = arith.constant 0.0833333358 : f32
    %70 = vector.broadcast %cst_13 : f32 to vector<8x8xf32>
    %71 = arith.mulf %69, %70 : vector<8x8xf32>
    %72 = arith.subf %2, %24 : vector<8x8xf32>
    %73 = arith.subf %72, %3 : vector<8x8xf32>
    %cst_14 = arith.constant 0.0833333358 : f32
    %74 = vector.broadcast %cst_14 : f32 to vector<8x8xf32>
    %75 = arith.mulf %73, %74 : vector<8x8xf32>
    %c0_15 = arith.constant 0 : index
    %c0_16 = arith.constant 0 : index
    %c0_17 = arith.constant 0 : index
    %76 = vector.load %arg2[%c0_15, %c0_16, %c0_17] : memref<8x16x8xbf16, #tpu.memory_space<vmem>>, vector<8x16x8xbf16>
    %77 = arith.extf %76 : vector<8x16x8xbf16> to vector<8x16x8xf32>
    %cst_18 = arith.constant dense<0.000000e+00> : vector<8x8xf32>
    %78 = vector.multi_reduction <add>, %77, %cst_18 [1] : vector<8x16x8xf32> to vector<8x8xf32>
    %cst_19 = arith.constant 0.000000e+00 : f32
    %79 = vector.broadcast %cst_19 : f32 to vector<8x8xf32>
    %80 = vector.extract_strided_slice %77 {offsets = [0, 0, 0], sizes = [8, 1, 8], strides = [1, 1, 1]} : vector<8x16x8xf32> to vector<8x1x8xf32>
    %81 = vector.shape_cast %80 : vector<8x1x8xf32> to vector<8x8xf32>
    %82 = arith.addf %79, %81 : vector<8x8xf32>
    %83 = vector.extract_strided_slice %77 {offsets = [0, 15, 0], sizes = [8, 1, 8], strides = [1, 1, 1]} : vector<8x16x8xf32> to vector<8x1x8xf32>
    %84 = vector.shape_cast %83 : vector<8x1x8xf32> to vector<8x8xf32>
    %85 = arith.addf %79, %84 : vector<8x8xf32>
    %86 = vector.extract_strided_slice %77 {offsets = [0, 1, 0], sizes = [8, 1, 8], strides = [1, 1, 1]} : vector<8x16x8xf32> to vector<8x1x8xf32>
    %87 = vector.shape_cast %86 : vector<8x1x8xf32> to vector<8x8xf32>
    %88 = arith.addf %82, %87 : vector<8x8xf32>
    %89 = vector.extract_strided_slice %77 {offsets = [0, 14, 0], sizes = [8, 1, 8], strides = [1, 1, 1]} : vector<8x16x8xf32> to vector<8x1x8xf32>
    %90 = vector.shape_cast %89 : vector<8x1x8xf32> to vector<8x8xf32>
    %91 = arith.addf %85, %90 : vector<8x8xf32>
    %92 = vector.extract_strided_slice %77 {offsets = [0, 2, 0], sizes = [8, 1, 8], strides = [1, 1, 1]} : vector<8x16x8xf32> to vector<8x1x8xf32>
    %93 = vector.shape_cast %92 : vector<8x1x8xf32> to vector<8x8xf32>
    %94 = arith.addf %88, %93 : vector<8x8xf32>
    %95 = vector.extract_strided_slice %77 {offsets = [0, 13, 0], sizes = [8, 1, 8], strides = [1, 1, 1]} : vector<8x16x8xf32> to vector<8x1x8xf32>
    %96 = vector.shape_cast %95 : vector<8x1x8xf32> to vector<8x8xf32>
    %97 = arith.addf %91, %96 : vector<8x8xf32>
    %98 = vector.extract_strided_slice %77 {offsets = [0, 3, 0], sizes = [8, 1, 8], strides = [1, 1, 1]} : vector<8x16x8xf32> to vector<8x1x8xf32>
    %99 = vector.shape_cast %98 : vector<8x1x8xf32> to vector<8x8xf32>
    %100 = arith.addf %94, %99 : vector<8x8xf32>
    %101 = vector.extract_strided_slice %77 {offsets = [0, 12, 0], sizes = [8, 1, 8], strides = [1, 1, 1]} : vector<8x16x8xf32> to vector<8x1x8xf32>
    %102 = vector.shape_cast %101 : vector<8x1x8xf32> to vector<8x8xf32>
    %103 = arith.addf %97, %102 : vector<8x8xf32>
    %104 = arith.subf %78, %79 : vector<8x8xf32>
    %105 = arith.subf %104, %91 : vector<8x8xf32>
    %cst_20 = arith.constant 0.0714285746 : f32
    %106 = vector.broadcast %cst_20 : f32 to vector<8x8xf32>
    %107 = arith.mulf %105, %106 : vector<8x8xf32>
    %108 = arith.subf %78, %82 : vector<8x8xf32>
    %109 = arith.subf %108, %85 : vector<8x8xf32>
    %cst_21 = arith.constant 0.0714285746 : f32
    %110 = vector.broadcast %cst_21 : f32 to vector<8x8xf32>
    %111 = arith.mulf %109, %110 : vector<8x8xf32>
    %112 = arith.subf %78, %88 : vector<8x8xf32>
    %113 = arith.subf %112, %79 : vector<8x8xf32>
    %cst_22 = arith.constant 0.0714285746 : f32
    %114 = vector.broadcast %cst_22 : f32 to vector<8x8xf32>
    %115 = arith.mulf %113, %114 : vector<8x8xf32>
    %116 = arith.subf %78, %79 : vector<8x8xf32>
    %117 = arith.subf %116, %97 : vector<8x8xf32>
    %cst_23 = arith.constant 0.0769230798 : f32
    %118 = vector.broadcast %cst_23 : f32 to vector<8x8xf32>
    %119 = arith.mulf %117, %118 : vector<8x8xf32>
    %120 = arith.subf %78, %82 : vector<8x8xf32>
    %121 = arith.subf %120, %91 : vector<8x8xf32>
    %cst_24 = arith.constant 0.0769230798 : f32
    %122 = vector.broadcast %cst_24 : f32 to vector<8x8xf32>
    %123 = arith.mulf %121, %122 : vector<8x8xf32>
    %124 = arith.subf %78, %88 : vector<8x8xf32>
    %125 = arith.subf %124, %85 : vector<8x8xf32>
    %cst_25 = arith.constant 0.0769230798 : f32
    %126 = vector.broadcast %cst_25 : f32 to vector<8x8xf32>
    %127 = arith.mulf %125, %126 : vector<8x8xf32>
    %128 = arith.subf %78, %94 : vector<8x8xf32>
    %129 = arith.subf %128, %79 : vector<8x8xf32>
    %cst_26 = arith.constant 0.0769230798 : f32
    %130 = vector.broadcast %cst_26 : f32 to vector<8x8xf32>
    %131 = arith.mulf %129, %130 : vector<8x8xf32>
    %132 = arith.subf %78, %79 : vector<8x8xf32>
    %133 = arith.subf %132, %103 : vector<8x8xf32>
    %cst_27 = arith.constant 0.0833333358 : f32
    %134 = vector.broadcast %cst_27 : f32 to vector<8x8xf32>
    %135 = arith.mulf %133, %134 : vector<8x8xf32>
    %136 = arith.subf %78, %82 : vector<8x8xf32>
    %137 = arith.subf %136, %97 : vector<8x8xf32>
    %cst_28 = arith.constant 0.0833333358 : f32
    %138 = vector.broadcast %cst_28 : f32 to vector<8x8xf32>
    %139 = arith.mulf %137, %138 : vector<8x8xf32>
    %140 = arith.subf %78, %88 : vector<8x8xf32>
    %141 = arith.subf %140, %91 : vector<8x8xf32>
    %cst_29 = arith.constant 0.0833333358 : f32
    %142 = vector.broadcast %cst_29 : f32 to vector<8x8xf32>
    %143 = arith.mulf %141, %142 : vector<8x8xf32>
    %144 = arith.subf %78, %94 : vector<8x8xf32>
    %145 = arith.subf %144, %85 : vector<8x8xf32>
    %cst_30 = arith.constant 0.0833333358 : f32
    %146 = vector.broadcast %cst_30 : f32 to vector<8x8xf32>
    %147 = arith.mulf %145, %146 : vector<8x8xf32>
    %148 = arith.subf %78, %100 : vector<8x8xf32>
    %149 = arith.subf %148, %79 : vector<8x8xf32>
    %cst_31 = arith.constant 0.0833333358 : f32
    %150 = vector.broadcast %cst_31 : f32 to vector<8x8xf32>
    %151 = arith.mulf %149, %150 : vector<8x8xf32>
    %152 = tpu.concatenate %31, %107, %35, %111, %39, %115, %43, %119, %47, %123, %51, %127, %55, %131, %59, %135 in 1 : vector<8x8xf32>, vector<8x8xf32>, vector<8x8xf32>, vector<8x8xf32>, vector<8x8xf32>, vector<8x8xf32>, vector<8x8xf32>, vector<8x8xf32>, vector<8x8xf32>, vector<8x8xf32>, vector<8x8xf32>, vector<8x8xf32>, vector<8x8xf32>, vector<8x8xf32>, vector<8x8xf32>, vector<8x8xf32> -> vector<8x128xf32>
    %153 = tpu.concatenate %63, %139, %67, %143, %71, %147, %75, %151 in 1 : vector<8x8xf32>, vector<8x8xf32>, vector<8x8xf32>, vector<8x8xf32>, vector<8x8xf32>, vector<8x8xf32>, vector<8x8xf32>, vector<8x8xf32> -> vector<8x64xf32>
    %154 = tpu.concatenate %152, %153 in 1 : vector<8x128xf32>, vector<8x64xf32> -> vector<8x192xf32>
    %155 = arith.truncf %154 : vector<8x192xf32> to vector<8x192xbf16>
    %c0_32 = arith.constant 0 : index
    %c0_33 = arith.constant 0 : index
    %156 = vector.load %arg3[%c0_32, %c0_33] : memref<192x128xbf16, #tpu.memory_space<vmem>>, vector<192x128xbf16>
    %cst_34 = arith.constant dense<0.000000e+00> : vector<8x128xf32>
    %157 = tpu.matmul %155, %156, %cst_34 {dimension_numbers = #tpu.dot_dimension_numbers<[1], [0], [0], [1], [0, 0, 1, 1], [], []>} : vector<8x192xbf16>, vector<192x128xbf16>, vector<8x128xf32> -> vector<8x128xf32>
    %c0_35 = arith.constant 0 : index
    %c0_36 = arith.constant 0 : index
    %158 = vector.load %arg4[%c0_35, %c0_36] : memref<1x128xf32, #tpu.memory_space<vmem>>, vector<1x128xf32>
    %159 = vector.broadcast %158 : vector<1x128xf32> to vector<8x128xf32>
    %160 = arith.addf %157, %159 : vector<8x128xf32>
    %cst_37 = arith.constant 0.000000e+00 : f32
    %161 = vector.broadcast %cst_37 : f32 to vector<8x128xf32>
    %162 = arith.maximumf %160, %161 : vector<8x128xf32>
    %163 = arith.truncf %162 : vector<8x128xf32> to vector<8x128xbf16>
    %c0_38 = arith.constant 0 : index
    %c0_39 = arith.constant 0 : index
    %164 = vector.load %arg5[%c0_38, %c0_39] : memref<128x128xbf16, #tpu.memory_space<vmem>>, vector<128x128xbf16>
    %cst_40 = arith.constant dense<0.000000e+00> : vector<8x128xf32>
    %165 = tpu.matmul %163, %164, %cst_40 {dimension_numbers = #tpu.dot_dimension_numbers<[1], [0], [0], [1], [0, 0, 1, 1], [], []>} : vector<8x128xbf16>, vector<128x128xbf16>, vector<8x128xf32> -> vector<8x128xf32>
    %c0_41 = arith.constant 0 : index
    %c0_42 = arith.constant 0 : index
    %166 = vector.load %arg6[%c0_41, %c0_42] : memref<1x128xf32, #tpu.memory_space<vmem>>, vector<1x128xf32>
    %167 = vector.broadcast %166 : vector<1x128xf32> to vector<8x128xf32>
    %168 = arith.addf %165, %167 : vector<8x128xf32>
    %c0_43 = arith.constant 0 : index
    %c0_44 = arith.constant 0 : index
    %169 = vector.load %arg7[%c0_43, %c0_44] : memref<8x128xf32, #tpu.memory_space<vmem>>, vector<8x128xf32>
    tpu.vector_store %arg7[%c0_43, %c0_44], %168 {strides = array<i32>} : memref<8x128xf32, #tpu.memory_space<vmem>>, vector<8x128xf32>,
    return
  }
  func.func @transform_0(%arg0: i32) -> (i32, i32, i32) {
    %c0_i32 = arith.constant 0 : i32
    %c0_i32_0 = arith.constant 0 : i32
    %c0_i32_1 = arith.constant 0 : i32
    return %arg0, %c0_i32, %c0_i32_0 : i32, i32, i32
  }
  func.func @transform_1(%arg0: i32) -> (i32, i32, i32) {
    %c0_i32 = arith.constant 0 : i32
    %c0_i32_0 = arith.constant 0 : i32
    %c0_i32_1 = arith.constant 0 : i32
    return %arg0, %c0_i32, %c0_i32_0 : i32, i32, i32
  }
  func.func @transform_2(%arg0: i32) -> (i32, i32) {
    %c0_i32 = arith.constant 0 : i32
    %c0_i32_0 = arith.constant 0 : i32
    %c0_i32_1 = arith.constant 0 : i32
    return %c0_i32, %c0_i32_0 : i32, i32
  }
  func.func @transform_3(%arg0: i32) -> (i32, i32) {
    %c0_i32 = arith.constant 0 : i32
    %c0_i32_0 = arith.constant 0 : i32
    %c0_i32_1 = arith.constant 0 : i32
    return %c0_i32, %c0_i32_0 : i32, i32
  }
  func.func @transform_4(%arg0: i32) -> (i32, i32) {
    %c0_i32 = arith.constant 0 : i32
    %c0_i32_0 = arith.constant 0 : i32
    %c0_i32_1 = arith.constant 0 : i32
    return %c0_i32, %c0_i32_0 : i32, i32
  }
  func.func @transform_5(%arg0: i32) -> (i32, i32) {
    %c0_i32 = arith.constant 0 : i32
    %c0_i32_0 = arith.constant 0 : i32
    %c0_i32_1 = arith.constant 0 : i32
    return %c0_i32, %c0_i32_0 : i32, i32
  }
  func.func @transform_6(%arg0: i32) -> (i32, i32) {
    %c0_i32 = arith.constant 0 : i32
    %c0_i32_0 = arith.constant 0 : i32
    return %arg0, %c0_i32 : i32, i32
  }
}

</mosaic_0001>

<bundles_post_ra>
// kernel: tpu_custom_call.1
= control target key start
LH: loop header
LB: loop body
LE: loop exit
PB: predicated region body
PF: predicated region fallthrough
CT: control target
= control target key end

     0   :  { %11 = vsyncpa [#allocation3], 0  ;;  %s4298_s0 = inlined_call_operand.vmem [shape: bf16[16,16,8], index: 0, kind: input, shape index: {}]   ;;  %s4299_s1 = inlined_call_operand.vmem [shape: bf16[16,16,8], index: 1, kind: input, shape index: {}]   ;;  %s4300_s2 = inlined_call_operand.vmem [shape: bf16[192,128], index: 2, kind: input, shape index: {}]   ;;  %s4301_s3 = inlined_call_operand.vmem [shape: f32[1,128], index: 3, kind: input, shape index: {}]   ;;  %s4302_s4 = inlined_call_operand.vmem [shape: bf16[128,128], index: 4, kind: input, shape index: {}]   ;;  %s4303_s5 = inlined_call_operand.vmem [shape: f32[1,128], index: 5, kind: input, shape index: {}]   ;;  %s4304_s6 = inlined_call_operand.hbm [shape: f32[16,128], index: 6, kind: output, shape index: {}]  }
   0x1   :  { %13 = vsyncpa [#allocation3 + $0x1], 0  ;;  %s2852_s21 = smov 0   ;;  %s2854_s22 = smov 0  }
   0x2   :  { %s2856_s23 = smov 0   ;;  %s2858_s24 = smov 0  }
   0x3 LB: > { %s2873_s25 = sadd.s32 4294967295, %s2796_s24   ;;  %s2437_s26 = sadd.s32 4294967294, %s2796_s24   ;;  %s2796_s24 = sphi %s2858_s24, %s4829_s24   ;;  %s2792_s23 = sphi %s2856_s23, %s4828_s23   ;;  %s2788_s22 = sphi %s2854_s22, %s4827_s22   ;;  %s2784_s21 = sphi %s2852_s21, %s4826_s21  }
   0x4   : > { %s2877_s27 = sadd.s32 1, %s2796_s24   ;;  %s162_s28 = sadd.s32 1, %s2792_s23 }
   0x5   : > { %s159_s29 = ssub.s32 %s2796_s24, %s2877_s27  ;;  %p172_p0 = scmp.ne.s32.totalorder %s2792_s23, %s2788_s22 }
   0x6   : > { %p160_p1 = scmp.eq.s32.totalorder %s159_s29, 0  ;;  %p173_p2 = scmp.eq.s32.totalorder %s2873_s25, 1 }
   0x7   : > { %p178_p3 = scmp.ne.s32.totalorder %s2788_s22, %s2784_s21  ;;  %p179_p4 = scmp.eq.s32.totalorder %s2437_s26, 1 }
   0x8   : > { %s2888_s30 = scalar_select %p160_p1, %s2792_s23, %s162_s28  }
   0x9   : > { %p2890_p5 = por %p173_p2, %p172_p0  ;;  %p2894_p6 = por %p179_p4, %p178_p3 }
   0xa   : > { %p2440_p7 = scmp.ge.s32.totalorder %s2796_s24, 1  ;;  %p229_p8 = scmp.lt.s32.totalorder %s2796_s24, 3 }
   0xc   : > { %p230_p9 = pnand %p2440_p7, %p229_p8 }
   0xe   : > { %233 = sbr.rel (%p230_p9) target bundleno = 840 (0x348), region = 44 }
  0x13   : > { %s2442_s9 = sshll.u32 %s2873_s25, 3  ;;  %vm313_vm0 = vcmask 64512   ;;  %vm1396_vm1 = vcmask 1041409   ;;  %vm1399_vm2 = vcmask 1042434   ;;  %vm1402_vm3 = vcmask 1043459   ;;  %s2798_s17 = smov 8  }
  0x14   : > { %p267_p10 = scmp.lt.s32.totalorder %s2442_s9, 15  ;;  %vm1405_vm4 = vcmask 1044484   ;;  %vm1408_vm5 = vcmask 1045509   ;;  %vm1411_vm6 = vcmask 1046534   ;;  %s2799_s18 = smov 32   ;;  %vm1885_vm7 = vcmask 1047559  }
  0x15   : > { %s2800_s19 = smov 40   ;;  %s2801_s20 = smov 48   ;;  %vm1822_vm8 = vcmask 130048   ;;  %vm1825_vm9 = vcmask 195584   ;;  %vm1828_vm10 = vcmask 261120   ;;  %vm1831_vm11 = vcmask 326656  }
  0x16   : > { %s4831_s9 = smov (!%p267_p10, %s2442_s9), 15  ;;  %s2802_s26 = smov 56   ;;  %vm1834_vm12 = vcmask 392192   ;;  %vm1837_vm13 = vcmask 457728   ;;  %vm1840_vm14 = vcmask 523264   ;;  %vm1843_vm15 = vcmask 588800  }
  0x17   : > { %s2475_s10 = sshll.u32 %s4831_s9, 3  ;;  %s2803_s28 = smov 96  }
  0x18   : > { %s278_s13 = scalar_lea.vmem %s4299_s1, %s2475_s10  ;;  %s3052_s16 = scalar_lea.vmem %s4298_s0, %s2475_s10 }
  0x19   : > { %v2510_v0 = vld [vmem:[%s278_s13] sm:$0xff]   ;;  %v2548_v1 = vld [vmem:[%s278_s13 + $0x8] sm:$0xff]   ;;  %v2549_v2 = vld [vmem:[%s278_s13 + $0x10] sm:$0xff]   ;;  %s2804_s29 = smov 104   ;;  %s2805_s9 = smov 16  }
  0x1a   : > { %v2909_v3 = vunpack.c.l.bf16 %v2510_v0  ;;  %v2911_v4 = vunpack.c.h.bf16 %v2510_v0  ;;  %v2913_v5 = vunpack.c.l.bf16 %v2548_v1  ;;  %v2915_v6 = vunpack.c.h.bf16 %v2548_v1  ;;  %v2550_v7 = vld [vmem:[%s278_s13 + $0x18] sm:$0xff]   ;;  %v2551_v8 = vld [vmem:[%s278_s13 + $0x20] sm:$0xff]   ;;  %v2552_v9 = vld [vmem:[%s278_s13 + $0x28] sm:$0xff]   ;;  %s2806_s10 = smov 24   ;;  %s2807_s11 = smov 64  }
  0x1b   : > { %v2917_v10 = vunpack.c.l.bf16 %v2549_v2  ;;  %v2919_v11 = vunpack.c.h.bf16 %v2549_v2  ;;  %v2921_v12 = vunpack.c.l.bf16 %v2550_v7  ;;  %v2923_v13 = vunpack.c.h.bf16 %v2550_v7  ;;  %v2553_v14 = vld [vmem:[%s278_s13 + $0x30] sm:$0xff]   ;;  %v2554_v15 = vld [vmem:[%s278_s13 + $0x38] sm:$0xff]   ;;  %s2808_s12 = smov 72   ;;  %s2809_s13 = smov 80  }
  0x1c   : > { %4521 = vst [vmem:[#allocation5_spill] sm:$0xff] %v2909_v3  ;;  %4522 = vst [vmem:[#allocation6_spill] sm:$0xff] %v2911_v4  ;;  %v2925_v16 = vunpack.c.l.bf16 %v2551_v8  ;;  %v2927_v17 = vunpack.c.h.bf16 %v2551_v8  ;;  %v2929_v18 = vunpack.c.l.bf16 %v2552_v9  ;;  %v2931_v19 = vunpack.c.h.bf16 %v2552_v9  ;;  %s2810_s14 = smov 88   ;;  %s2811_s15 = smov 112  }
  0x1d   : > { %4523 = vst [vmem:[#allocation7_spill] sm:$0xff] %v2915_v6  ;;  %4524 = vst [vmem:[#allocation8_spill] sm:$0xff] %v2919_v11  ;;  %v2933_v20 = vunpack.c.l.bf16 %v2553_v14  ;;  %v2935_v21 = vunpack.c.h.bf16 %v2553_v14  ;;  %v2937_v22 = vunpack.c.l.bf16 %v2554_v15  ;;  %v2939_v23 = vunpack.c.h.bf16 %v2554_v15 }
  0x1e   : > { %4525 = vst [vmem:[#allocation9_spill] sm:$0xff] %v2923_v13  ;;  %4526 = vst [vmem:[#allocation10_spill] sm:$0xff] %v2927_v17  ;;  %v866_v24 = vsel %vm313_vm0, %v2909_v3, 0.0  ;;  %v867_v25 = vsel %vm313_vm0, %v2911_v4, 0.0  ;;  %v875_v26 = vsel %vm313_vm0, %v2913_v5, 0.0  ;;  %v876_v27 = vsel %vm313_vm0, %v2915_v6, 0.0 }
  0x1f   : > { %4527 = vst [vmem:[#allocation11_spill] sm:$0xff] %v2931_v19  ;;  %4528 = vst [vmem:[#allocation12_spill] sm:$0xff] %v2935_v21  ;;  %v868_v28 = vadd.f32 %v867_v25, %v866_v24  ;;  %v877_v29 = vadd.f32 %v876_v27, %v875_v26  ;;  %v884_v30 = vsel %vm313_vm0, %v2917_v10, 0.0  ;;  %v885_v31 = vsel %vm313_vm0, %v2919_v11, 0.0 }
  0x20   : > { %4529 = vst [vmem:[#allocation13_spill] sm:$0xff] %v2937_v22  ;;  %4530 = vst [vmem:[#allocation14_spill] sm:$0xff] %v2939_v23  ;;  %v886_v32 = vadd.f32 %v885_v31, %v884_v30  ;;  %v893_v33 = vsel %vm313_vm0, %v2921_v12, 0.0  ;;  %v894_v34 = vsel %vm313_vm0, %v2923_v13, 0.0  ;;  %v902_v35 = vsel %vm313_vm0, %v2925_v16, 0.0 }
  0x21   : > { %v869_v36 = vrot.slane %v868_v28, 4  ;;  %v878_v37 = vrot.slane %v877_v29, 4  ;;  %v895_v38 = vadd.f32 %v894_v34, %v893_v33  ;;  %v903_v39 = vsel %vm313_vm0, %v2927_v17, 0.0 }
  0x22   : > { %v887_v40 = vrot.slane %v886_v32, 4  ;;  %v904_v41 = vadd.f32 %v903_v39, %v902_v35  ;;  %v911_v42 = vsel %vm313_vm0, %v2929_v18, 0.0  ;;  %v912_v43 = vsel %vm313_vm0, %v2931_v19, 0.0 }
  0x23   : > { %v870_v44 = vadd.f32 %v869_v36, %v868_v28  ;;  %v879_v45 = vadd.f32 %v878_v37, %v877_v29  ;;  %v896_v46 = vrot.slane %v895_v38, 4  ;;  %v913_v47 = vadd.f32 %v912_v43, %v911_v42 }
  0x24   : > { %v888_v48 = vadd.f32 %v887_v40, %v886_v32  ;;  %v905_v49 = vrot.slane %v904_v41, 4  ;;  %v920_v50 = vsel %vm313_vm0, %v2933_v20, 0.0  ;;  %v921_v51 = vsel %vm313_vm0, %v2935_v21, 0.0 }
  0x25   : > { %v871_v52 = vrot.slane %v870_v44, 2  ;;  %v880_v53 = vrot.slane %v879_v45, 2  ;;  %v897_v54 = vadd.f32 %v896_v46, %v895_v38  ;;  %v914_v55 = vrot.slane %v913_v47, 4 }
  0x26   : > { %v889_v56 = vrot.slane %v888_v48, 2  ;;  %v906_v57 = vadd.f32 %v905_v49, %v904_v41  ;;  %v922_v58 = vadd.f32 %v921_v51, %v920_v50  ;;  %v929_v59 = vsel %vm313_vm0, %v2937_v22, 0.0 }
  0x27   : > { %v872_v60 = vadd.f32 %v871_v52, %v870_v44  ;;  %v881_v61 = vadd.f32 %v880_v53, %v879_v45  ;;  %v898_v62 = vrot.slane %v897_v54, 2  ;;  %v915_v63 = vadd.f32 %v914_v55, %v913_v47 }
  0x28   : > { %v890_v0 = vadd.f32 %v889_v56, %v888_v48  ;;  %v907_v1 = vrot.slane %v906_v57, 2  ;;  %v923_v2 = vrot.slane %v922_v58, 4  ;;  %v930_v7 = vsel %vm313_vm0, %v2939_v23, 0.0 }
  0x29   : > { %v873_v8 = vrot.slane %v872_v60, 1  ;;  %v882_v9 = vrot.slane %v881_v61, 1  ;;  %v899_v14 = vadd.f32 %v898_v62, %v897_v54  ;;  %v916_v15 = vrot.slane %v915_v63, 2 }
  0x2a   : > { %v891_v24 = vrot.slane %v890_v0, 1  ;;  %v908_v25 = vadd.f32 %v907_v1, %v906_v57  ;;  %v924_v26 = vadd.f32 %v923_v2, %v922_v58  ;;  %v931_v27 = vadd.f32 %v930_v7, %v929_v59 }
  0x2b   : > { %v2973_v28 = vadd.f32 %v873_v8, %v872_v60  ;;  %v2975_v29 = vadd.f32 %v882_v9, %v881_v61  ;;  %v900_v30 = vrot.slane %v899_v14, 1  ;;  %v917_v31 = vadd.f32 %v916_v15, %v915_v63  ;;  %v2478_v8 = vld [vmem:[%s3052_s16] sm:$0xff]  }
  0x2c   : > { %v2977_v32 = vadd.f32 %v891_v24, %v890_v0  ;;  %v909_v33 = vrot.slane %v908_v25, 1  ;;  %v925_v34 = vrot.slane %v924_v26, 2  ;;  %v932_v35 = vrot.slane %v931_v27, 4 }
  0x2d   : > { %4531 = vst [vmem:[#allocation15_spill] sm:$0xff] %v2973_v28  ;;  %4532 = vst [vmem:[#allocation16_spill] sm:$0xff] %v2975_v29  ;;  %v2979_v36 = vadd.f32 %v900_v30, %v899_v14  ;;  %v918_v37 = vrot.slane %v917_v31, 1  ;;  %v2982_v38 = vrot.slane %v2911_v4, 7  ;;  %v2985_v39 = vrot.slane %v2915_v6, 7 }
  0x2e   : > { %4533 = vst [vmem:[#allocation17_spill] sm:$0xff] %v2977_v32  ;;  %v2987_v40 = vadd.f32 %v909_v33, %v908_v25  ;;  %v926_v41 = vadd.f32 %v925_v34, %v924_v26  ;;  %v933_v42 = vadd.f32 %v932_v35, %v931_v27  ;;  %v2990_v43 = vrot.slane %v2919_v11, 7  ;;  %v2541_v25 = vld [vmem:[%s3052_s16 + $0x8] sm:$0xff]  }
  0x2f   : > { %4534 = vst [vmem:[#allocation18_spill] sm:$0xff] %v2979_v36  ;;  %4535 = vst [vmem:[#allocation19_spill] sm:$0xff] %v2982_v38  ;;  %v2992_v44 = vadd.f32 %v918_v37, %v917_v31  ;;  %v2995_v45 = vrot.slane %v2923_v13, 7  ;;  %v2998_v46 = vrot.slane %v2927_v17, 7  ;;  %v3001_v47 = vrot.slane %v2931_v19, 7 }
  0x30   : > { %4536 = vst [vmem:[#allocation20_spill] sm:$0xff] %v2985_v39  ;;  %4537 = vst [vmem:[#allocation21_spill] sm:$0xff] %v2987_v40  ;;  %v927_v48 = vrot.slane %v926_v41, 1  ;;  %v934_v49 = vrot.slane %v933_v42, 2  ;;  %v3004_v50 = vrot.slane %v2935_v21, 7  ;;  %v3007_v51 = vrot.slane %v2939_v23, 7 }
  0x31   : > { %4538 = vst [vmem:[#allocation22_spill] sm:$0xff] %v2990_v43  ;;  %4539 = vst [vmem:[#allocation23_spill] sm:$0xff] %v2992_v44  ;;  %v3011_v52 = vadd.f32 %v2911_v4, %v2982_v38  ;;  %v3015_v53 = vadd.f32 %v2915_v6, %v2985_v39  ;;  %v3019_v54 = vadd.f32 %v2919_v11, %v2990_v43  ;;  %v3068_v37 = vunpack.c.l.bf16 %v2478_v8 }
  0x32   : > { %4540 = vst [vmem:[#allocation24_spill] sm:$0xff] %v2995_v45  ;;  %4541 = vst [vmem:[#allocation25_spill] sm:$0xff] %v2998_v46  ;;  %v3023_v55 = vadd.f32 %v2923_v13, %v2995_v45  ;;  %v3025_v56 = vadd.f32 %v927_v48, %v926_v41  ;;  %v935_v57 = vadd.f32 %v934_v49, %v933_v42  ;;  %v2542_v41 = vld [vmem:[%s3052_s16 + $0x10] sm:$0xff]  }
  0x33   : > { %4542 = vst [vmem:[#allocation26_spill] sm:$0xff] %v3001_v47  ;;  %4543 = vst [vmem:[#allocation27_spill] sm:$0xff] %v3004_v50  ;;  %v3029_v58 = vadd.f32 %v2927_v17, %v2998_v46  ;;  %v3033_v59 = vadd.f32 %v2931_v19, %v3001_v47  ;;  %v3037_v60 = vadd.f32 %v2935_v21, %v3004_v50  ;;  %v2545_v50 = vld [vmem:[%s3052_s16 + $0x28] sm:$0xff]  }
  0x34   : > { %4544 = vst [vmem:[#allocation28_spill] sm:$0xff] %v3007_v51  ;;  %4545 = vst [vmem:[#allocation29_spill] sm:$0xff] %v3011_v52  ;;  %v3041_v61 = vadd.f32 %v2939_v23, %v3007_v51  ;;  %v1114_v62 = vsub.f32 %v2973_v28, %v3011_v52  ;;  %v1115_v63 = vsub.f32 %v2975_v29, %v3015_v53  ;;  %v936_v0 = vrot.slane %v935_v57, 1 }
  0x35   : > { %4546 = vst [vmem:[#allocation30_spill] sm:$0xff] %v3015_v53  ;;  %4547 = vst [vmem:[#allocation31_spill] sm:$0xff] %v3019_v54  ;;  %v1116_v1 = vsub.f32 %v2977_v32, %v3019_v54  ;;  %v1117_v2 = vsub.f32 %v2979_v36, %v3023_v55  ;;  %v1118_v7 = vsub.f32 %v2987_v40, %v3029_v58  ;;  %v3082_v51 = vunpack.c.l.bf16 %v2542_v41 }
  0x36   : > { %4548 = vst [vmem:[#allocation32_spill] sm:$0xff] %v3023_v55  ;;  %4549 = vst [vmem:[#allocation33_spill] sm:$0xff] %v3025_v56  ;;  %v1119_v9 = vsub.f32 %v2992_v44, %v3033_v59  ;;  %v1120_v14 = vsub.f32 %v3025_v56, %v3037_v60  ;;  %v1122_v15 = vmul.f32 0.071428575, %v1114_v62  ;;  %v1123_v24 = vmul.f32 0.071428575, %v1115_v63 }
  0x37   : > { %4550 = vst [vmem:[#allocation34_spill] sm:$0xff] %v3029_v58  ;;  %4551 = vst [vmem:[#allocation35_spill] sm:$0xff] %v3033_v59  ;;  %v3066_v26 = vadd.f32 %v936_v0, %v935_v57  ;;  %v1124_v27 = vmul.f32 0.071428575, %v1116_v1  ;;  %v1125_v30 = vmul.f32 0.071428575, %v1117_v2  ;;  %v3074_v1 = vunpack.c.h.bf16 %v2478_v8 }
  0x38   : > { %4552 = vst [vmem:[#allocation36_spill] sm:$0xff] %v3037_v60  ;;  %4553 = vst [vmem:[#allocation37_spill] sm:$0xff] %v3041_v61  ;;  %v1126_v31 = vmul.f32 0.071428575, %v1118_v7  ;;  %v1127_v33 = vmul.f32 0.071428575, %v1119_v9  ;;  %v3076_v2 = vunpack.c.l.bf16 %v2541_v25  ;;  %v3102_v45 = vunpack.c.h.bf16 %v2545_v50 }
  0x39   : > { %4554 = vst [vmem:[#allocation38_spill] sm:$0xff] %v3066_v26  ;;  %v1128_v34 = vmul.f32 0.071428575, %v1120_v14  ;;  %v1423_v35 = vrot.slane %v1123_v24, 7  ;;  %v1121_v42 = vsub.f32 %v3066_v26, %v3041_v61  ;;  %v1424_v48 = vrot.slane %v1124_v27, 6  ;;  %v2543_v57 = vld [vmem:[%s3052_s16 + $0x18] sm:$0xff]  }
  0x3a   : > { %v1426_v49 = vrot.slane %v1125_v30, 5  ;;  %v1428_v62 = vrot.slane %v1126_v31, 4  ;;  %v1430_v63 = vrot.slane %v1127_v33, 3  ;;  %4555 = vst [vmem:[#allocation39_spill] sm:$0xff] %v3074_v1  ;;  %v2544_v7 = vld [vmem:[%s3052_s16 + $0x20] sm:$0xff]   ;;  %v3080_v24 = vunpack.c.h.bf16 %v2541_v25  ;;  %v2546_v27 = vld [vmem:[%s3052_s16 + $0x30] sm:$0xff]  }
  0x3b   : > { %v1432_v0 = vrot.slane %v1128_v34, 2  ;;  %v1129_v9 = vmul.f32 0.071428575, %v1121_v42  ;;  %v1425_v14 = vsel %vm1396_vm1, %v1424_v48, %v1423_v35  ;;  %v3087_v31 = vunpack.c.h.bf16 %v2542_v41  ;;  %v2547_v34 = vld [vmem:[%s3052_s16 + $0x38] sm:$0xff]   ;;  %4561 = vst [vmem:[#allocation45_spill] sm:$0xff] %v3102_v45 }
  0x3c   : > { %4556 = vst [vmem:[#allocation40_spill] sm:$0xff] %v3080_v24  ;;  %v1427_v30 = vsel %vm1399_vm2, %v1426_v49, %v1425_v14  ;;  %v3089_v33 = vunpack.c.l.bf16 %v2543_v57  ;;  %v3091_v8 = vunpack.c.h.bf16 %v2543_v57  ;;  %v3095_v46 = vunpack.c.l.bf16 %v2544_v7 }
  0x3d   : > { %4557 = vst [vmem:[#allocation41_spill] sm:$0xff] %v3087_v31  ;;  %v1429_v47 = vsel %vm1402_vm3, %v1428_v62, %v1427_v30  ;;  %v1434_v42 = vrot.slane %v1129_v9, 1  ;;  %v3097_v25 = vunpack.c.h.bf16 %v2544_v7  ;;  %v3100_v48 = vunpack.c.l.bf16 %v2545_v50 }
  0x3e   : > { %4558 = vst [vmem:[#allocation42_spill] sm:$0xff] %v3091_v8  ;;  %v1431_v35 = vsel %vm1405_vm4, %v1430_v63, %v1429_v47  ;;  %v3104_v41 = vunpack.c.l.bf16 %v2546_v27  ;;  %v3107_v57 = vunpack.c.h.bf16 %v2546_v27  ;;  %v3109_v14 = vunpack.c.l.bf16 %v2547_v34 }
  0x3f   : > { %4559 = vst [vmem:[#allocation43_spill] sm:$0xff] %v3097_v25  ;;  %4560 = vst [vmem:[#allocation44_spill] sm:$0xff] %v3100_v48  ;;  %v1433_v49 = vsel %vm1408_vm5, %v1432_v0, %v1431_v35  ;;  %v3111_v62 = vunpack.c.h.bf16 %v2547_v34  ;;  %v314_v7 = vsel %vm313_vm0, %v3068_v37, 0.0  ;;  %v315_v47 = vsel %vm313_vm0, %v3074_v1, 0.0 }
  0x40   : > { %4562 = vst [vmem:[#allocation46_spill] sm:$0xff] %v3104_v41  ;;  %4563 = vst [vmem:[#allocation47_spill] sm:$0xff] %v3107_v57  ;;  %v1435_v9 = vsel %vm1411_vm6, %v1434_v42, %v1433_v49  ;;  %v323_v50 = vsel %vm313_vm0, %v3076_v2, 0.0  ;;  %v316_v30 = vadd.f32 %v315_v47, %v314_v7  ;;  %v324_v0 = vsel %vm313_vm0, %v3080_v24, 0.0 }
  0x41   : > { %4564 = vst [vmem:[#allocation48_spill] sm:$0xff] %v3109_v14  ;;  %4565 = vst [vmem:[#allocation49_spill] sm:$0xff] %v3111_v62  ;;  %v2641_v63 = vpack.i.bf16 %v1435_v9, %v1122_v15  ;;  %v332_v27 = vsel %vm313_vm0, %v3082_v51, 0.0  ;;  %v325_v34 = vadd.f32 %v324_v0, %v323_v50  ;;  %v333_v42 = vsel %vm313_vm0, %v3087_v31, 0.0 }
  0x42   : > { %v341_v35 = vsel %vm313_vm0, %v3089_v33, 0.0  ;;  %v342_v49 = vsel %vm313_vm0, %v3091_v8, 0.0  ;;  %v317_v15 = vrot.slane %v316_v30, 4  ;;  %v334_v9 = vadd.f32 %v333_v42, %v332_v27 }
  0x43   : > { %2642 = vrot.lane.b32.xlu0 %v2641_v63, %s2798_s17  ;;  %v343_v7 = vadd.f32 %v342_v49, %v341_v35  ;;  %v350_v47 = vsel %vm313_vm0, %v3095_v46, 0.0  ;;  %v326_v43 = vrot.slane %v325_v34, 4  ;;  %v351_v50 = vsel %vm313_vm0, %v3097_v25, 0.0 }
  0x44   : > { %v359_v0 = vsel %vm313_vm0, %v3100_v48, 0.0  ;;  %v360_v39 = vsel %vm313_vm0, %v3102_v45, 0.0  ;;  %v318_v38 = vadd.f32 %v317_v15, %v316_v30  ;;  %v335_v61 = vrot.slane %v334_v9, 4 }
  0x45   : > { %v344_v60 = vrot.slane %v343_v7, 4  ;;  %v352_v63 = vadd.f32 %v351_v50, %v350_v47  ;;  %v327_v59 = vadd.f32 %v326_v43, %v325_v34  ;;  %v361_v27 = vadd.f32 %v360_v39, %v359_v0 }
  0x46   : > { %v368_v42 = vsel %vm313_vm0, %v3104_v41, 0.0  ;;  %v369_v35 = vsel %vm313_vm0, %v3107_v57, 0.0  ;;  %v319_v49 = vrot.slane %v318_v38, 2  ;;  %v336_v58 = vadd.f32 %v335_v61, %v334_v9 }
  0x47   : > { %v345_v55 = vadd.f32 %v344_v60, %v343_v7  ;;  %v353_v54 = vrot.slane %v352_v63, 4  ;;  %v328_v53 = vrot.slane %v327_v59, 2  ;;  %v362_v23 = vrot.slane %v361_v27, 4 }
  0x48   : > { %v370_v21 = vadd.f32 %v369_v35, %v368_v42  ;;  %v377_v30 = vsel %vm313_vm0, %v3109_v14, 0.0  ;;  %v320_v15 = vadd.f32 %v319_v49, %v318_v38  ;;  %v337_v47 = vrot.slane %v336_v58, 2 }
  0x49   : > { %v346_v43 = vrot.slane %v345_v55, 2  ;;  %v354_v39 = vadd.f32 %v353_v54, %v352_v63  ;;  %v329_v34 = vadd.f32 %v328_v53, %v327_v59  ;;  %v363_v50 = vadd.f32 %v362_v23, %v361_v27 }
  0x4a   : > { %v371_v0 = vrot.slane %v370_v21, 4  ;;  %v378_v19 = vsel %vm313_vm0, %v3111_v62, 0.0  ;;  %v321_v17 = vrot.slane %v320_v15, 1  ;;  %v338_v61 = vadd.f32 %v337_v47, %v336_v58 }
  0x4b   : > { %v347_v60 = vadd.f32 %v346_v43, %v345_v55  ;;  %v355_v9 = vrot.slane %v354_v39, 2  ;;  %v330_v7 = vrot.slane %v329_v34, 1  ;;  %v364_v13 = vrot.slane %v363_v50, 2 }
  0x4c   : > { %v372_v42 = vadd.f32 %v371_v0, %v370_v21  ;;  %v379_v35 = vadd.f32 %v378_v19, %v377_v30  ;;  %v3147_v11 = vadd.f32 %v321_v17, %v320_v15  ;;  %v339_v38 = vrot.slane %v338_v61, 1 }
  0x4d   : > { %v348_v49 = vrot.slane %v347_v60, 1  ;;  %v356_v52 = vadd.f32 %v355_v9, %v354_v39  ;;  %v3149_v54 = vadd.f32 %v330_v7, %v329_v34  ;;  %v365_v23 = vadd.f32 %v364_v13, %v363_v50 }
  0x4e   : > { %4566 = vst [vmem:[#allocation50_spill] sm:$0xff] %v3147_v11  ;;  %v373_v53 = vrot.slane %v372_v42, 2  ;;  %v380_v59 = vrot.slane %v379_v35, 4  ;;  %v3151_v63 = vadd.f32 %v339_v38, %v338_v61  ;;  %v410_v58 = vrot.slane %v3068_v37, 1 }
  0x4f   : > { %4567 = vst [vmem:[#allocation51_spill] sm:$0xff] %v3149_v54  ;;  %v3153_v27 = vadd.f32 %v348_v49, %v347_v60  ;;  %v357_v55 = vrot.slane %v356_v52, 1  ;;  %v366_v47 = vrot.slane %v365_v23, 1  ;;  %v411_v17 = vrot.slane %v3076_v2, 1 }
  0x50   : > { %4568 = vst [vmem:[#allocation52_spill] sm:$0xff] %v3151_v63  ;;  %v374_v21 = vadd.f32 %v373_v53, %v372_v42  ;;  %v381_v19 = vadd.f32 %v380_v59, %v379_v35  ;;  %v412_v15 = vrot.slane %v3082_v51, 1  ;;  %v413_v13 = vrot.slane %v3089_v33, 1 }
  0x51   : > { %4569 = vst [vmem:[#allocation53_spill] sm:$0xff] %v3153_v27  ;;  %v3157_v30 = vadd.f32 %v357_v55, %v356_v52  ;;  %v414_v43 = vrot.slane %v3095_v46, 1  ;;  %v3162_v39 = vadd.f32 %v366_v47, %v365_v23  ;;  %v415_v0 = vrot.slane %v3100_v48, 1 }
  0x52   : > { %v375_v34 = vrot.slane %v374_v21, 1  ;;  %v382_v50 = vrot.slane %v381_v19, 2  ;;  %v416_v61 = vrot.slane %v3104_v41, 1  ;;  %v417_v60 = vrot.slane %v3109_v14, 1 }
  0x53   : > { %4570 = vst [vmem:[#allocation54_spill] sm:$0xff] %v3157_v30  ;;  %4571 = vst [vmem:[#allocation55_spill] sm:$0xff] %v3162_v39  ;;  %v426_v9 = vadd.f32 %v3068_v37, %v410_v58  ;;  %v3169_v52 = vadd.f32 %v3076_v2, %v411_v17  ;;  %v3174_v35 = vadd.f32 %v3082_v51, %v412_v15  ;;  %v466_v58 = vrot.slane %v3068_v37, 2 }
  0x54   : > { %v3171_v7 = vadd.f32 %v375_v34, %v374_v21  ;;  %v383_v42 = vadd.f32 %v382_v50, %v381_v19  ;;  %v3177_v38 = vadd.f32 %v3089_v33, %v413_v13  ;;  %v3180_v49 = vadd.f32 %v3095_v46, %v414_v43 }
  0x55   : > { %4572 = vst [vmem:[#allocation56_spill] sm:$0xff] %v3169_v52  ;;  %4574 = vst [vmem:[#allocation58_spill] sm:$0xff] %v3174_v35  ;;  %v3183_v23 = vadd.f32 %v3100_v48, %v415_v0  ;;  %v3186_v53 = vadd.f32 %v3104_v41, %v416_v61  ;;  %v3189_v59 = vadd.f32 %v3109_v14, %v417_v60  ;;  %v514_v47 = vrot.slane %v3068_v37, 3 }
  0x56   : > { %4573 = vst [vmem:[#allocation57_spill] sm:$0xff] %v3171_v7  ;;  %4575 = vst [vmem:[#allocation59_spill] sm:$0xff] %v3177_v38  ;;  %v384_v55 = vrot.slane %v383_v42, 1  ;;  %v3194_v21 = vsub.f32 %v3147_v11, %v426_v9  ;;  %v3198_v19 = vsub.f32 %v3149_v54, %v3169_v52  ;;  %v3202_v17 = vsub.f32 %v3151_v63, %v3174_v35 }
  0x57   : > { %4576 = vst [vmem:[#allocation60_spill] sm:$0xff] %v3180_v49  ;;  %4577 = vst [vmem:[#allocation61_spill] sm:$0xff] %v3183_v23  ;;  %v3206_v15 = vsub.f32 %v3153_v27, %v3177_v38  ;;  %v3210_v13 = vsub.f32 %v3157_v30, %v3180_v49  ;;  %v3214_v34 = vadd.f32 %v466_v58, %v426_v9 }
  0x58   : > { %4578 = vst [vmem:[#allocation62_spill] sm:$0xff] %v3186_v53  ;;  %4579 = vst [vmem:[#allocation63_spill] sm:$0xff] %v3189_v59  ;;  %v3212_v43 = vadd.f32 %v384_v55, %v383_v42  ;;  %v3218_v50 = vsub.f32 %v3162_v39, %v3183_v23  ;;  %v3222_v0 = vsub.f32 %v3171_v7, %v3186_v53  ;;  %v634_v61 = vmul.f32 0.071428575, %v3194_v21 }
  0x59   : > { %4580 = vst [vmem:[#allocation64_spill] sm:$0xff] %v3194_v21  ;;  %4581 = vst [vmem:[#allocation65_spill] sm:$0xff] %v3198_v19  ;;  %v635_v60 = vmul.f32 0.071428575, %v3198_v19  ;;  %v636_v6 = vmul.f32 0.071428575, %v3202_v17  ;;  %v530_v4 = vadd.f32 %v514_v47, %v3214_v34 }
  0x5a   : > { %4582 = vst [vmem:[#allocation66_spill] sm:$0xff] %v3202_v17  ;;  %4583 = vst [vmem:[#allocation67_spill] sm:$0xff] %v3206_v15  ;;  %v3230_v9 = vsub.f32 %v3212_v43, %v3189_v59  ;;  %v637_v42 = vmul.f32 0.071428575, %v3206_v15  ;;  %v638_v55 = vmul.f32 0.071428575, %v3210_v13 }
  0x5b   : > { %4584 = vst [vmem:[#allocation68_spill] sm:$0xff] %v3210_v13  ;;  %4585 = vst [vmem:[#allocation69_spill] sm:$0xff] %v3212_v43  ;;  %v639_v58 = vmul.f32 0.071428575, %v3218_v50  ;;  %v640_v53 = vmul.f32 0.071428575, %v3222_v0  ;;  %v818_v17 = vsub.f32 %v3147_v11, %v530_v4 }
  0x5c   : > { %4586 = vst [vmem:[#allocation70_spill] sm:$0xff] %v3218_v50  ;;  %4587 = vst [vmem:[#allocation71_spill] sm:$0xff] %v3222_v0  ;;  %v1504_v23 = vrot.slane %v634_v61, 1  ;;  %v1505_v21 = vrot.slane %v636_v6, 7  ;;  %v641_v19 = vmul.f32 0.071428575, %v3230_v9 }
  0x5d   : > { %4588 = vst [vmem:[#allocation72_spill] sm:$0xff] %v3230_v9  ;;  %v1507_v49 = vrot.slane %v637_v42, 6  ;;  %v1509_v47 = vrot.slane %v638_v55, 5  ;;  %v1511_v59 = vrot.slane %v639_v58, 4  ;;  %v1513_v35 = vrot.slane %v640_v53, 3 }
  0x5e   : > { %v1506_v38 = vsel %vm1396_vm1, %v1505_v21, %v635_v60  ;;  %v962_v15 = vrot.slane %v2909_v3, 1  ;;  %v3240_v52 = vmul.f32 0.083333336, %v818_v17  ;;  %v1515_v13 = vrot.slane %v641_v19, 2 }
  0x5f   : > { %v1508_v50 = vsel %vm1399_vm2, %v1507_v49, %v1506_v38  ;;  %v963_v61 = vrot.slane %v2913_v5, 1  ;;  %v964_v9 = vrot.slane %v2917_v10, 1  ;;  %v965_v4 = vrot.slane %v2921_v12, 1 }
  0x60   : > { %v1510_v6 = vsel %vm1402_vm3, %v1509_v47, %v1508_v50  ;;  %v966_v42 = vrot.slane %v2925_v16, 1  ;;  %v967_v53 = vrot.slane %v2929_v18, 1  ;;  %v968_v17 = vrot.slane %v2933_v20, 1 }
  0x61   : > { %v1512_v21 = vsel %vm1405_vm4, %v1511_v59, %v1510_v6  ;;  %v969_v60 = vrot.slane %v2937_v22, 1  ;;  %v978_v49 = vadd.f32 %v2909_v3, %v962_v15  ;;  %v3255_v19 = vadd.f32 %v2913_v5, %v963_v61 }
  0x62   : > { %v1514_v38 = vsel %vm1408_vm5, %v1513_v35, %v1512_v21  ;;  %v3258_v50 = vadd.f32 %v2917_v10, %v964_v9  ;;  %v3262_v59 = vadd.f32 %v2921_v12, %v965_v4  ;;  %v3265_v58 = vadd.f32 %v2925_v16, %v966_v42 }
  0x63   : > { %4589 = vst [vmem:[#allocation73_spill] sm:$0xff] %v3255_v19  ;;  %v1516_v55 = vsel %vm1411_vm6, %v1515_v13, %v1514_v38  ;;  %v3268_v47 = vadd.f32 %v2929_v18, %v967_v53  ;;  %v3271_v15 = vadd.f32 %v2933_v20, %v968_v17  ;;  %v3274_v61 = vadd.f32 %v2937_v22, %v969_v60 }
  0x64   : > { %4590 = vst [vmem:[#allocation74_spill] sm:$0xff] %v3258_v50  ;;  %4591 = vst [vmem:[#allocation75_spill] sm:$0xff] %v3262_v59  ;;  %v2646_v35 = vpack.i.bf16 %v1516_v55, %v1504_v23  ;;  %v1018_v9 = vrot.slane %v2909_v3, 2  ;;  %v1066_v13 = vrot.slane %v2909_v3, 3  ;;  %v3279_v6 = vsub.f32 %v2973_v28, %v978_v49 }
  0x65   : > { %4592 = vst [vmem:[#allocation76_spill] sm:$0xff] %v3265_v58  ;;  %4593 = vst [vmem:[#allocation77_spill] sm:$0xff] %v3268_v47  ;;  %v3283_v4 = vsub.f32 %v2975_v29, %v3255_v19  ;;  %v3287_v23 = vsub.f32 %v2977_v32, %v3258_v50  ;;  %v3294_v21 = vsub.f32 %v2979_v36, %v3262_v59 }
  0x66   : > { %4594 = vst [vmem:[#allocation78_spill] sm:$0xff] %v3271_v15  ;;  %4595 = vst [vmem:[#allocation79_spill] sm:$0xff] %v3274_v61  ;;  %2647 = vrot.lane.b32.xlu1 %v2646_v35, %s2799_s18  ;;  %v3290_v42 = vadd.f32 %v1018_v9, %v978_v49  ;;  %v3298_v53 = vsub.f32 %v2987_v40, %v3265_v58  ;;  %v3302_v17 = vsub.f32 %v2992_v44, %v3268_v47 }
  0x67   : > { %4596 = vst [vmem:[#allocation80_spill] sm:$0xff] %v3279_v6  ;;  %4597 = vst [vmem:[#allocation81_spill] sm:$0xff] %v3283_v4  ;;  %v3306_v60 = vsub.f32 %v3025_v56, %v3271_v15  ;;  %v3310_v38 = vsub.f32 %v3066_v26, %v3274_v61  ;;  %v1186_v49 = vmul.f32 0.071428575, %v3279_v6  ;;  %v1187_v55 = vmul.f32 0.071428575, %v3283_v4 }
  0x68   : > { %4598 = vst [vmem:[#allocation82_spill] sm:$0xff] %v3287_v23  ;;  %4599 = vst [vmem:[#allocation83_spill] sm:$0xff] %v3294_v21  ;;  %v1082_v35 = vadd.f32 %v1066_v13, %v3290_v42  ;;  %v1188_v9 = vmul.f32 0.071428575, %v3287_v23  ;;  %v1189_v0 = vmul.f32 0.071428575, %v3294_v21 }
  0x69   : > { %4600 = vst [vmem:[#allocation84_spill] sm:$0xff] %v3298_v53  ;;  %4601 = vst [vmem:[#allocation85_spill] sm:$0xff] %v3302_v17  ;;  %v1190_v3 = vmul.f32 0.071428575, %v3298_v53  ;;  %v1191_v47 = vmul.f32 0.071428575, %v3302_v17 }
  0x6a   : > { %4602 = vst [vmem:[#allocation86_spill] sm:$0xff] %v3306_v60  ;;  %4603 = vst [vmem:[#allocation87_spill] sm:$0xff] %v3310_v38  ;;  %v1192_v15 = vmul.f32 0.071428575, %v3306_v60  ;;  %v1193_v58 = vmul.f32 0.071428575, %v3310_v38  ;;  %v1370_v61 = vsub.f32 %v2973_v28, %v1082_v35 }
  0x6b   : > { %v1531_v59 = vrot.slane %v1186_v49, 1  ;;  %v1532_v6 = vrot.slane %v1188_v9, 7  ;;  %v1534_v50 = vrot.slane %v1189_v0, 6  ;;  %v1536_v4 = vrot.slane %v1190_v3, 5 }
  0x6c   : > { %v1538_v19 = vrot.slane %v1191_v47, 4  ;;  %v1540_v13 = vrot.slane %v1192_v15, 3  ;;  %v1542_v22 = vrot.slane %v1193_v58, 2  ;;  %v3322_v23 = vmul.f32 0.083333336, %v1370_v61 }
  0x6d   : > { %v1533_v21 = vsel %vm1396_vm1, %v1532_v6, %v1187_v55  ;;  %v3326_v53 = vrot.slane %v3074_v1, 7  ;;  %v3329_v60 = vrot.slane %v3080_v24, 7  ;;  %v3333_v49 = vrot.slane %v3087_v31, 7 }
  0x6e   : > { %v1535_v38 = vsel %vm1399_vm2, %v1534_v50, %v1533_v21  ;;  %v3336_v3 = vrot.slane %v3091_v8, 7  ;;  %v3339_v0 = vrot.slane %v3097_v25, 7  ;;  %v3343_v47 = vrot.slane %v3102_v45, 7 }
  0x6f   : > { %4604 = vst [vmem:[#allocation88_spill] sm:$0xff] %v3329_v60  ;;  %4605 = vst [vmem:[#allocation89_spill] sm:$0xff] %v3333_v49  ;;  %v1537_v58 = vsel %vm1402_vm3, %v1536_v4, %v1535_v38  ;;  %v3346_v15 = vrot.slane %v3107_v57, 7  ;;  %v3349_v61 = vrot.slane %v3111_v62, 7  ;;  %v3354_v6 = vadd.f32 %v3074_v1, %v3326_v53 }
  0x70   : > { %4606 = vst [vmem:[#allocation90_spill] sm:$0xff] %v3336_v3  ;;  %4607 = vst [vmem:[#allocation91_spill] sm:$0xff] %v3339_v0  ;;  %v1539_v50 = vsel %vm1405_vm4, %v1538_v19, %v1537_v58  ;;  %v3358_v21 = vadd.f32 %v3080_v24, %v3329_v60  ;;  %v3362_v4 = vadd.f32 %v3087_v31, %v3333_v49  ;;  %v494_v49 = vrot.slane %v3097_v25, 6 }
  0x71   : > { %4608 = vst [vmem:[#allocation92_spill] sm:$0xff] %v3343_v47  ;;  %4609 = vst [vmem:[#allocation93_spill] sm:$0xff] %v3346_v15  ;;  %v1541_v38 = vsel %vm1408_vm5, %v1540_v13, %v1539_v50  ;;  %v3367_v55 = vadd.f32 %v3091_v8, %v3336_v3  ;;  %v3371_v19 = vadd.f32 %v3097_v25, %v3339_v0  ;;  %v490_v50 = vrot.slane %v3074_v1, 6 }
  0x72   : > { %4610 = vst [vmem:[#allocation94_spill] sm:$0xff] %v3349_v61  ;;  %4611 = vst [vmem:[#allocation95_spill] sm:$0xff] %v3354_v6  ;;  %v3375_v35 = vadd.f32 %v3102_v45, %v3343_v47  ;;  %v1543_v9 = vsel %vm1411_vm6, %v1542_v22, %v1541_v38  ;;  %v3380_v58 = vadd.f32 %v3107_v57, %v3346_v15  ;;  %v491_v0 = vrot.slane %v3080_v24, 6 }
  0x73   : > { %4612 = vst [vmem:[#allocation96_spill] sm:$0xff] %v3358_v21  ;;  %4613 = vst [vmem:[#allocation97_spill] sm:$0xff] %v3362_v4  ;;  %v3384_v13 = vadd.f32 %v3111_v62, %v3349_v61  ;;  %v2651_v17 = vpack.i.bf16 %v1543_v9, %v1531_v59  ;;  %v492_v3 = vrot.slane %v3087_v31, 6  ;;  %v493_v47 = vrot.slane %v3091_v8, 6  ;;  %v4637_v61 = vld [vmem:[#allocation29_spill] sm:$0xff] }
  0x74   : > { %4614 = vst [vmem:[#allocation98_spill] sm:$0xff] %v3367_v55  ;;  %4615 = vst [vmem:[#allocation99_spill] sm:$0xff] %v3371_v19  ;;  %v495_v22 = vrot.slane %v3102_v45, 6  ;;  %v496_v38 = vrot.slane %v3107_v57, 6  ;;  %v497_v15 = vrot.slane %v3111_v62, 6  ;;  %v3396_v1 = vadd.f32 %v490_v50, %v3354_v6 }
  0x75   : > { %4616 = vst [vmem:[#allocation100_spill] sm:$0xff] %v3375_v35  ;;  %4617 = vst [vmem:[#allocation101_spill] sm:$0xff] %v3380_v58  ;;  %2652 = vrot.lane.b32.xlu0 %v2651_v17, %s2800_s19  ;;  %v3399_v59 = vadd.f32 %v491_v0, %v3358_v21  ;;  %v3402_v9 = vadd.f32 %v492_v3, %v3362_v4  ;;  %v3405_v25 = vadd.f32 %v493_v47, %v3367_v55  ;;  %v4633_v4 = vld [vmem:[#allocation62_spill] sm:$0xff] }
  0x76   : > { %4618 = vst [vmem:[#allocation102_spill] sm:$0xff] %v3384_v13  ;;  %4619 = vst [vmem:[#allocation103_spill] sm:$0xff] %v3396_v1  ;;  %v3408_v45 = vadd.f32 %v494_v49, %v3371_v19  ;;  %v3411_v62 = vadd.f32 %v495_v22, %v3375_v35  ;;  %v3414_v17 = vadd.f32 %v496_v38, %v3380_v58 }
  0x77   : > { %4620 = vst [vmem:[#allocation104_spill] sm:$0xff] %v3399_v59  ;;  %4621 = vst [vmem:[#allocation105_spill] sm:$0xff] %v3402_v9  ;;  %v3417_v50 = vadd.f32 %v497_v15, %v3384_v13  ;;  %v642_v0 = vsub.f32 %v3147_v11, %v3396_v1  ;;  %v643_v3 = vsub.f32 %v3149_v54, %v3399_v59 }
  0x78   : > { %4622 = vst [vmem:[#allocation106_spill] sm:$0xff] %v3405_v25  ;;  %4623 = vst [vmem:[#allocation107_spill] sm:$0xff] %v3408_v45  ;;  %v644_v47 = vsub.f32 %v3151_v63, %v3402_v9  ;;  %v645_v49 = vsub.f32 %v3153_v27, %v3405_v25  ;;  %v646_v22 = vsub.f32 %v3157_v30, %v3408_v45 }
  0x79   : > { %4624 = vst [vmem:[#allocation108_spill] sm:$0xff] %v3411_v62  ;;  %4625 = vst [vmem:[#allocation109_spill] sm:$0xff] %v3414_v17  ;;  %v647_v38 = vsub.f32 %v3162_v39, %v3411_v62  ;;  %v648_v15 = vsub.f32 %v3171_v7, %v3414_v17  ;;  %v649_v1 = vsub.f32 %v3212_v43, %v3417_v50  ;;  %v650_v57 = vmul.f32 0.07692308, %v642_v0 }
  0x7a   : > { %4626 = vst [vmem:[#allocation110_spill] sm:$0xff] %v3417_v50  ;;  %v651_v59 = vmul.f32 0.07692308, %v643_v3  ;;  %v652_v8 = vmul.f32 0.07692308, %v644_v47  ;;  %v3437_v9 = vsub.f32 %v3147_v11, %v3214_v34  ;;  %v3441_v45 = vsub.f32 %v3147_v11, %v3068_v37  ;;  %v4631_v11 = vld [vmem:[#allocation60_spill] sm:$0xff] }
  0x7b   : > { %v653_v25 = vmul.f32 0.07692308, %v645_v49  ;;  %v654_v31 = vmul.f32 0.07692308, %v646_v22  ;;  %v655_v24 = vmul.f32 0.07692308, %v647_v38 }
  0x7c   : > { %4627 = vst [vmem:[#allocation111_spill] sm:$0xff] %v3441_v45  ;;  %v656_v62 = vmul.f32 0.07692308, %v648_v15  ;;  %v657_v13 = vmul.f32 0.07692308, %v649_v1  ;;  %v1558_v17 = vrot.slane %v651_v59, 7 }
  0x7d   : > { %v1559_v0 = vrot.slane %v652_v8, 6  ;;  %v1561_v3 = vrot.slane %v653_v25, 5  ;;  %v1563_v47 = vrot.slane %v654_v31, 4  ;;  %v1565_v58 = vrot.slane %v655_v24, 3  ;;  %v4628_v31 = vld [vmem:[#allocation56_spill] sm:$0xff] }
  0x7e   : > { %v1567_v35 = vrot.slane %v656_v62, 2  ;;  %v1569_v34 = vrot.slane %v657_v13, 1  ;;  %v467_v49 = vrot.slane %v3076_v2, 2  ;;  %v468_v22 = vrot.slane %v3082_v51, 2  ;;  %v4629_v13 = vld [vmem:[#allocation58_spill] sm:$0xff] }
  0x7f   : > { %v1560_v38 = vsel %vm1396_vm1, %v1559_v0, %v1558_v17  ;;  %v469_v37 = vrot.slane %v3089_v33, 2  ;;  %v470_v1 = vrot.slane %v3095_v46, 2  ;;  %v471_v59 = vrot.slane %v3100_v48, 2  ;;  %v4630_v17 = vld [vmem:[#allocation59_spill] sm:$0xff] }
  0x80   : > { %v1562_v15 = vsel %vm1399_vm2, %v1561_v3, %v1560_v38  ;;  %v472_v8 = vrot.slane %v3104_v41, 2  ;;  %v473_v24 = vrot.slane %v3109_v14, 2  ;;  %v3455_v25 = vadd.f32 %v467_v49, %v4628_v31  ;;  %v4632_v38 = vld [vmem:[#allocation61_spill] sm:$0xff]  ;;  %v4634_v49 = vld [vmem:[#allocation63_spill] sm:$0xff] }
  0x81   : > { %v1564_v62 = vsel %vm1402_vm3, %v1563_v47, %v1562_v15  ;;  %v3459_v50 = vadd.f32 %v468_v22, %v4629_v13  ;;  %v3462_v0 = vadd.f32 %v469_v37, %v4630_v17  ;;  %v3465_v19 = vadd.f32 %v470_v1, %v4631_v11 }
  0x82   : > { %v1566_v3 = vsel %vm1405_vm4, %v1565_v58, %v1564_v62  ;;  %v3469_v55 = vadd.f32 %v471_v59, %v4632_v38  ;;  %v3472_v21 = vadd.f32 %v472_v8, %v4633_v4  ;;  %v3475_v31 = vadd.f32 %v473_v24, %v4634_v49  ;;  %v4635_v49 = vld [vmem:[#allocation6_spill] sm:$0xff] }
  0x83   : > { %v1568_v47 = vsel %vm1408_vm5, %v1567_v35, %v1566_v3  ;;  %v515_v22 = vrot.slane %v3076_v2, 3  ;;  %v516_v37 = vrot.slane %v3082_v51, 3  ;;  %v517_v11 = vrot.slane %v3089_v33, 3 }
  0x84   : > { %v1570_v1 = vsel %vm1411_vm6, %v1569_v34, %v1568_v47  ;;  %v518_v58 = vrot.slane %v3095_v46, 3  ;;  %v519_v59 = vrot.slane %v3100_v48, 3  ;;  %v520_v4 = vrot.slane %v3104_v41, 3  ;;  %v4639_v41 = vld [vmem:[#allocation8_spill] sm:$0xff] }
  0x85   : > { %v2656_v15 = vpack.i.bf16 %v1570_v1, %v650_v57  ;;  %v521_v8 = vrot.slane %v3109_v14, 3  ;;  %v531_v24 = vadd.f32 %v515_v22, %v3455_v25  ;;  %v532_v35 = vadd.f32 %v516_v37, %v3459_v50 }
  0x86   : > { %v533_v62 = vadd.f32 %v517_v11, %v3462_v0  ;;  %v534_v13 = vadd.f32 %v518_v58, %v3465_v19  ;;  %v535_v17 = vadd.f32 %v519_v59, %v3469_v55  ;;  %v536_v34 = vadd.f32 %v520_v4, %v3472_v21 }
  0x87   : > { %2657 = vrot.lane.b32.xlu1 %v2656_v15, %s2801_s20  ;;  %v537_v3 = vadd.f32 %v521_v8, %v3475_v31  ;;  %v819_v57 = vsub.f32 %v3149_v54, %v531_v24  ;;  %v820_v38 = vsub.f32 %v3151_v63, %v532_v35  ;;  %v1042_v47 = vrot.slane %v4635_v49, 6  ;;  %v4636_v15 = vld [vmem:[#allocation7_spill] sm:$0xff] }
  0x88   : > { %v821_v22 = vsub.f32 %v3153_v27, %v533_v62  ;;  %v822_v37 = vsub.f32 %v3157_v30, %v534_v13  ;;  %v823_v11 = vsub.f32 %v3162_v39, %v535_v17  ;;  %v824_v1 = vsub.f32 %v3171_v7, %v536_v34 }
  0x89   : > { %v825_v58 = vsub.f32 %v3212_v43, %v537_v3  ;;  %v827_v59 = vmul.f32 0.083333336, %v819_v57  ;;  %v828_v4 = vmul.f32 0.083333336, %v820_v38  ;;  %v1043_v8 = vrot.slane %v4636_v15, 6 }
  0x8a   : > { %v829_v24 = vmul.f32 0.083333336, %v821_v22  ;;  %v830_v6 = vmul.f32 0.083333336, %v822_v37  ;;  %v831_v35 = vmul.f32 0.083333336, %v823_v11  ;;  %v3504_v49 = vadd.f32 %v1042_v47, %v4637_v61 }
  0x8b   : > { %v832_v62 = vmul.f32 0.083333336, %v824_v1  ;;  %v833_v60 = vmul.f32 0.083333336, %v825_v58  ;;  %v2021_v13 = vrot.slane %v827_v59, 7  ;;  %v2023_v45 = vrot.slane %v828_v4, 6 }
  0x8c   : > { %4638 = vst [vmem:[#allocation56_spill] sm:$0xff] %v3504_v49  ;;  %v2025_v17 = vrot.slane %v829_v24, 5  ;;  %v2027_v14 = vrot.slane %v830_v6, 4  ;;  %v2029_v34 = vrot.slane %v831_v35, 3  ;;  %v1044_v48 = vrot.slane %v4639_v41, 6  ;;  %v4640_v22 = vld [vmem:[#allocation9_spill] sm:$0xff] }
  0x8d   : > { %v2022_v3 = vsel %vm1396_vm1, %v2021_v13, %v3240_v52  ;;  %v2031_v57 = vrot.slane %v832_v62, 2  ;;  %v2033_v38 = vrot.slane %v833_v60, 1  ;;  %v1045_v37 = vrot.slane %v4640_v22, 6  ;;  %v4641_v47 = vld [vmem:[#allocation10_spill] sm:$0xff]  ;;  %v4642_v1 = vld [vmem:[#allocation11_spill] sm:$0xff]  ;;  %v4643_v59 = vld [vmem:[#allocation12_spill] sm:$0xff] }
  0x8e   : > { %v2024_v11 = vsel %vm1399_vm2, %v2023_v45, %v2022_v3  ;;  %v1046_v15 = vrot.slane %v4641_v47, 6  ;;  %v1047_v58 = vrot.slane %v4642_v1, 6  ;;  %v1048_v4 = vrot.slane %v4643_v59, 6  ;;  %v4644_v24 = vld [vmem:[#allocation14_spill] sm:$0xff]  ;;  %v4647_v52 = vld [vmem:[#allocation31_spill] sm:$0xff]  ;;  %v4649_v13 = vld [vmem:[#allocation32_spill] sm:$0xff] }
  0x8f   : > { %v2026_v6 = vsel %vm1402_vm3, %v2025_v17, %v2024_v11  ;;  %v1049_v35 = vrot.slane %v4644_v24, 6  ;;  %v4645_v41 = vld [vmem:[#allocation30_spill] sm:$0xff]  ;;  %v3520_v62 = vadd.f32 %v1044_v48, %v4647_v52  ;;  %v3524_v45 = vadd.f32 %v1045_v37, %v4649_v13  ;;  %v4653_v1 = vld [vmem:[#allocation35_spill] sm:$0xff]  ;;  %v4655_v11 = vld [vmem:[#allocation36_spill] sm:$0xff] }
  0x90   : > { %v3517_v61 = vadd.f32 %v1043_v8, %v4645_v41  ;;  %v2028_v60 = vsel %vm1405_vm4, %v2027_v14, %v2026_v6  ;;  %v4651_v3 = vld [vmem:[#allocation34_spill] sm:$0xff]  ;;  %v3530_v59 = vadd.f32 %v1047_v58, %v4653_v1  ;;  %v3534_v24 = vadd.f32 %v1048_v4, %v4655_v11  ;;  %v4657_v8 = vld [vmem:[#allocation37_spill] sm:$0xff] }
  0x91   : > { %4648 = vst [vmem:[#allocation59_spill] sm:$0xff] %v3520_v62  ;;  %4650 = vst [vmem:[#allocation60_spill] sm:$0xff] %v3524_v45  ;;  %v3527_v47 = vadd.f32 %v1046_v15, %v4651_v3  ;;  %v2030_v17 = vsel %vm1408_vm5, %v2029_v34, %v2028_v60  ;;  %v3537_v22 = vadd.f32 %v1049_v35, %v4657_v8 }
  0x92   : > { %4646 = vst [vmem:[#allocation58_spill] sm:$0xff] %v3517_v61  ;;  %4654 = vst [vmem:[#allocation62_spill] sm:$0xff] %v3530_v59  ;;  %v1194_v48 = vsub.f32 %v2973_v28, %v3504_v49  ;;  %v2032_v14 = vsel %vm1411_vm6, %v2031_v57, %v2030_v17  ;;  %v1195_v15 = vsub.f32 %v2975_v29, %v3517_v61  ;;  %v4665_v61 = vld [vmem:[#allocation78_spill] sm:$0xff] }
  0x93   : > { %4652 = vst [vmem:[#allocation61_spill] sm:$0xff] %v3527_v47  ;;  %4656 = vst [vmem:[#allocation63_spill] sm:$0xff] %v3534_v24  ;;  %v1196_v37 = vsub.f32 %v2977_v32, %v3520_v62  ;;  %v1197_v34 = vsub.f32 %v2979_v36, %v3524_v45  ;;  %v2034_v58 = vsel %vm1885_vm7, %v2033_v38, %v2032_v14 }
  0x94   : > { %4658 = vst [vmem:[#allocation112_spill] sm:$0xff] %v3537_v22  ;;  %v1198_v4 = vsub.f32 %v2987_v40, %v3527_v47  ;;  %v1199_v6 = vsub.f32 %v2992_v44, %v3530_v59  ;;  %v1200_v57 = vsub.f32 %v3025_v56, %v3534_v24  ;;  %2035 = vrot.lane.b32.xlu0 %v2034_v58, %s2801_s20  ;;  %v1202_v60 = vmul.f32 0.07692308, %v1194_v48  ;;  %v4663_v47 = vld [vmem:[#allocation76_spill] sm:$0xff] }
  0x95   : > { %v1201_v35 = vsub.f32 %v3066_v26, %v3537_v22  ;;  %v1203_v17 = vmul.f32 0.07692308, %v1195_v15  ;;  %v1204_v8 = vmul.f32 0.07692308, %v1196_v37  ;;  %v1205_v11 = vmul.f32 0.07692308, %v1197_v34 }
  0x96   : > { %v1206_v1 = vmul.f32 0.07692308, %v1198_v4  ;;  %v1207_v38 = vmul.f32 0.07692308, %v1199_v6  ;;  %v3560_v14 = vsub.f32 %v2973_v28, %v3290_v42  ;;  %v1208_v3 = vmul.f32 0.07692308, %v1200_v57 }
  0x97   : > { %v1209_v13 = vmul.f32 0.07692308, %v1201_v35  ;;  %v1585_v52 = vrot.slane %v1203_v17, 7  ;;  %v3564_v41 = vsub.f32 %v3149_v54, %v3455_v25  ;;  %v1586_v58 = vrot.slane %v1204_v8, 6 }
  0x98   : > { %v1588_v24 = vrot.slane %v1205_v11, 5  ;;  %v1590_v22 = vrot.slane %v1206_v1, 4  ;;  %v1592_v48 = vrot.slane %v1207_v38, 3  ;;  %v1594_v15 = vrot.slane %v1208_v3, 2  ;;  %v4659_v1 = vld [vmem:[#allocation13_spill] sm:$0xff]  ;;  %v4661_v38 = vld [vmem:[#allocation74_spill] sm:$0xff] }
  0x99   : > { %v1596_v37 = vrot.slane %v1209_v13, 1  ;;  %v1019_v34 = vrot.slane %v2913_v5, 2  ;;  %v1020_v4 = vrot.slane %v2917_v10, 2  ;;  %v1587_v42 = vsel %vm1396_vm1, %v1586_v58, %v1585_v52  ;;  %v4660_v3 = vld [vmem:[#allocation73_spill] sm:$0xff]  ;;  %v4662_v52 = vld [vmem:[#allocation75_spill] sm:$0xff] }
  0x9a   : > { %v1021_v6 = vrot.slane %v2921_v12, 2  ;;  %v1022_v57 = vrot.slane %v2925_v16, 2  ;;  %v1023_v35 = vrot.slane %v2929_v18, 2  ;;  %v1589_v25 = vsel %vm1399_vm2, %v1588_v24, %v1587_v42  ;;  %v4664_v42 = vld [vmem:[#allocation77_spill] sm:$0xff] }
  0x9b   : > { %v1024_v11 = vrot.slane %v2933_v20, 2  ;;  %v1025_v8 = vrot.slane %v4659_v1, 2  ;;  %v3576_v13 = vadd.f32 %v1019_v34, %v4660_v3  ;;  %v1591_v17 = vsel %vm1402_vm3, %v1590_v22, %v1589_v25  ;;  %v4666_v34 = vld [vmem:[#allocation79_spill] sm:$0xff] }
  0x9c   : > { %v3580_v59 = vadd.f32 %v1020_v4, %v4661_v38  ;;  %v3583_v58 = vadd.f32 %v1021_v6, %v4662_v52  ;;  %v3586_v45 = vadd.f32 %v1022_v57, %v4663_v47  ;;  %v1593_v24 = vsel %vm1405_vm4, %v1592_v48, %v1591_v17 }
  0x9d   : > { %v3590_v62 = vadd.f32 %v1023_v35, %v4664_v42  ;;  %v3593_v28 = vadd.f32 %v1024_v11, %v4665_v61  ;;  %v3596_v3 = vadd.f32 %v1025_v8, %v4666_v34  ;;  %v1595_v22 = vsel %vm1408_vm5, %v1594_v15, %v1593_v24 }
  0x9e   : > { %v1067_v4 = vrot.slane %v2913_v5, 3  ;;  %v1068_v6 = vrot.slane %v2917_v10, 3  ;;  %v1069_v47 = vrot.slane %v2921_v12, 3  ;;  %v1597_v57 = vsel %vm1411_vm6, %v1596_v37, %v1595_v22 }
  0x9f   : > { %v1070_v48 = vrot.slane %v2925_v16, 3  ;;  %v1071_v35 = vrot.slane %v2929_v18, 3  ;;  %v1072_v61 = vrot.slane %v2933_v20, 3  ;;  %v2661_v25 = vpack.i.bf16 %v1597_v57, %v1202_v60 }
  0xa0   : > { %v1073_v11 = vrot.slane %v4659_v1, 3  ;;  %v1083_v8 = vadd.f32 %v1067_v4, %v3576_v13  ;;  %v1084_v15 = vadd.f32 %v1068_v6, %v3580_v59  ;;  %v1085_v17 = vadd.f32 %v1069_v47, %v3583_v58 }
  0xa1   : > { %v1086_v38 = vadd.f32 %v1070_v48, %v3586_v45  ;;  %v1087_v52 = vadd.f32 %v1071_v35, %v3590_v62  ;;  %v1088_v37 = vadd.f32 %v1072_v61, %v3593_v28  ;;  %2662 = vrot.lane.b32.xlu1 %v2661_v25, %s2802_s26  ;;  %v3619_v34 = vsub.f32 %v3151_v63, %v3459_v50 }
  0xa2   : > { %v1089_v24 = vadd.f32 %v1073_v11, %v3596_v3  ;;  %v1371_v60 = vsub.f32 %v2975_v29, %v1083_v8  ;;  %v1372_v42 = vsub.f32 %v2977_v32, %v1084_v15  ;;  %v1373_v22 = vsub.f32 %v2979_v36, %v1085_v17 }
  0xa3   : > { %v1374_v4 = vsub.f32 %v2987_v40, %v1086_v38  ;;  %v1375_v6 = vsub.f32 %v2992_v44, %v1087_v52  ;;  %v1376_v47 = vsub.f32 %v3025_v56, %v1088_v37  ;;  %v3628_v61 = vsub.f32 %v3153_v27, %v3462_v0 }
  0xa4   : > { %v1377_v57 = vsub.f32 %v3066_v26, %v1089_v24  ;;  %v1379_v48 = vmul.f32 0.083333336, %v1371_v60  ;;  %v1380_v35 = vmul.f32 0.083333336, %v1372_v42  ;;  %v1381_v25 = vmul.f32 0.083333336, %v1373_v22 }
  0xa5   : > { %v1382_v11 = vmul.f32 0.083333336, %v1374_v4  ;;  %v1383_v50 = vmul.f32 0.083333336, %v1375_v6  ;;  %v3632_v8 = vsub.f32 %v3157_v30, %v3465_v19  ;;  %v1384_v15 = vmul.f32 0.083333336, %v1376_v47 }
  0xa6   : > { %v1385_v17 = vmul.f32 0.083333336, %v1377_v57  ;;  %v2046_v38 = vrot.slane %v1379_v48, 7  ;;  %v2048_v52 = vrot.slane %v1380_v35, 6  ;;  %v2050_v37 = vrot.slane %v1381_v25, 5 }
  0xa7   : > { %4667 = vst [vmem:[#allocation73_spill] sm:$0xff] %v3632_v8  ;;  %v2052_v1 = vrot.slane %v1382_v11, 4  ;;  %v2054_v24 = vrot.slane %v1383_v50, 3  ;;  %v3636_v60 = vsub.f32 %v3162_v39, %v3469_v55  ;;  %v2056_v42 = vrot.slane %v1384_v15, 2  ;;  %v4696_v50 = vld [vmem:[#allocation94_spill] sm:$0xff] }
  0xa8   : > { %v2047_v0 = vsel %vm1396_vm1, %v2046_v38, %v3322_v23  ;;  %v2058_v22 = vrot.slane %v1385_v17, 1  ;;  %v3642_v19 = vsub.f32 %v3171_v7, %v3472_v21  ;;  %v3647_v6 = vsub.f32 %v3212_v43, %v3475_v31 }
  0xa9   : > { %4668 = vst [vmem:[#allocation74_spill] sm:$0xff] %v3636_v60  ;;  %v2049_v4 = vsel %vm1399_vm2, %v2048_v52, %v2047_v0  ;;  %v722_v47 = vmul.f32 0.07692308, %v3437_v9  ;;  %v723_v55 = vmul.f32 0.07692308, %v3564_v41 }
  0xaa   : > { %4669 = vst [vmem:[#allocation75_spill] sm:$0xff] %v3647_v6  ;;  %v2051_v57 = vsel %vm1402_vm3, %v2050_v37, %v2049_v4  ;;  %v724_v23 = vmul.f32 0.07692308, %v3619_v34  ;;  %v725_v48 = vmul.f32 0.07692308, %v3628_v61 }
  0xab   : > { %v726_v35 = vmul.f32 0.07692308, %v3632_v8  ;;  %v2053_v21 = vsel %vm1405_vm4, %v2052_v1, %v2051_v57  ;;  %v727_v25 = vmul.f32 0.07692308, %v3636_v60  ;;  %v728_v11 = vmul.f32 0.07692308, %v3642_v19 }
  0xac   : > { %v729_v31 = vmul.f32 0.07692308, %v3647_v6  ;;  %v2055_v15 = vsel %vm1408_vm5, %v2054_v24, %v2053_v21  ;;  %v1720_v17 = vrot.slane %v722_v47, 1  ;;  %v1721_v38 = vrot.slane %v724_v23, 7 }
  0xad   : > { %v2057_v52 = vsel %vm1411_vm6, %v2056_v42, %v2055_v15  ;;  %v1723_v37 = vrot.slane %v725_v48, 6  ;;  %v1725_v0 = vrot.slane %v726_v35, 5  ;;  %v1727_v4 = vrot.slane %v727_v25, 4 }
  0xae   : > { %v2059_v8 = vsel %vm1885_vm7, %v2058_v22, %v2057_v52  ;;  %v1722_v1 = vsel %vm1396_vm1, %v1721_v38, %v723_v55  ;;  %v1729_v57 = vrot.slane %v728_v11, 3  ;;  %v1731_v60 = vrot.slane %v729_v31, 2  ;;  %v4678_v38 = vld [vmem:[#allocation19_spill] sm:$0xff] }
  0xaf   : > { %2060 = vrot.lane.b32.xlu0 %v2059_v8, %s2802_s26  ;;  %v1724_v6 = vsel %vm1399_vm2, %v1723_v37, %v1722_v1  ;;  %v3668_v24 = vsub.f32 %v2975_v29, %v3576_v13  ;;  %v3672_v42 = vsub.f32 %v2977_v32, %v3580_v59  ;;  %v3676_v47 = vsub.f32 %v2979_v36, %v3583_v58 }
  0xb0   : > { %v1726_v22 = vsel %vm1402_vm3, %v1725_v0, %v1724_v6  ;;  %v3681_v55 = vsub.f32 %v2987_v40, %v3586_v45  ;;  %v3685_v8 = vsub.f32 %v2992_v44, %v3590_v62  ;;  %v3689_v13 = vsub.f32 %v3025_v56, %v3593_v28 }
  0xb1   : > { %4670 = vst [vmem:[#allocation76_spill] sm:$0xff] %v3668_v24  ;;  %4671 = vst [vmem:[#allocation77_spill] sm:$0xff] %v3672_v42  ;;  %v1728_v59 = vsel %vm1405_vm4, %v1727_v4, %v1726_v22  ;;  %v3694_v58 = vsub.f32 %v3066_v26, %v3596_v3  ;;  %v1274_v6 = vmul.f32 0.07692308, %v3560_v14  ;;  %v1275_v23 = vmul.f32 0.07692308, %v3668_v24 }
  0xb2   : > { %4672 = vst [vmem:[#allocation78_spill] sm:$0xff] %v3676_v47  ;;  %4673 = vst [vmem:[#allocation79_spill] sm:$0xff] %v3681_v55  ;;  %v1730_v45 = vsel %vm1408_vm5, %v1729_v57, %v1728_v59  ;;  %v1276_v48 = vmul.f32 0.07692308, %v3672_v42  ;;  %v1277_v62 = vmul.f32 0.07692308, %v3676_v47  ;;  %v4677_v11 = vsub.f32 %v3437_v9, %v3326_v53 }
  0xb3   : > { %4674 = vst [vmem:[#allocation113_spill] sm:$0xff] %v3685_v8  ;;  %4675 = vst [vmem:[#allocation114_spill] sm:$0xff] %v3689_v13  ;;  %v1278_v35 = vmul.f32 0.07692308, %v3681_v55  ;;  %v1732_v28 = vsel %vm1411_vm6, %v1731_v60, %v1730_v45  ;;  %v1279_v21 = vmul.f32 0.07692308, %v3685_v8  ;;  %v1354_v52 = vsub.f32 %v3560_v14, %v4678_v38 }
  0xb4   : > { %4676 = vst [vmem:[#allocation115_spill] sm:$0xff] %v3694_v58  ;;  %v1280_v25 = vmul.f32 0.07692308, %v3689_v13  ;;  %v1281_v3 = vmul.f32 0.07692308, %v3694_v58  ;;  %v2666_v15 = vpack.i.bf16 %v1732_v28, %v1720_v17  ;;  %v1748_v37 = vrot.slane %v1276_v48, 7 }
  0xb5   : > { %v3709_v31 = vmul.f32 0.083333336, %v4677_v11  ;;  %v1747_v0 = vrot.slane %v1274_v6, 1  ;;  %v1750_v4 = vrot.slane %v1277_v62, 6  ;;  %v1752_v1 = vrot.slane %v1278_v35, 5  ;;  %v4683_v48 = vld [vmem:[#allocation44_spill] sm:$0xff] }
  0xb6   : > { %v1754_v60 = vrot.slane %v1279_v21, 4  ;;  %2667 = vrot.lane.b32.xlu1 %v2666_v15, %s2803_s28  ;;  %v1749_v57 = vsel %vm1396_vm1, %v1748_v37, %v1275_v23  ;;  %v1756_v22 = vrot.slane %v1280_v25, 3  ;;  %v1758_v59 = vrot.slane %v1281_v3, 2  ;;  %v4685_v62 = vld [vmem:[#allocation46_spill] sm:$0xff]  ;;  %v4689_v21 = vld [vmem:[#allocation111_spill] sm:$0xff]  ;;  %v4690_v25 = vld [vmem:[#allocation88_spill] sm:$0xff] }
  0xb7   : > { %v3716_v9 = vsub.f32 %v3149_v54, %v3076_v2  ;;  %v1751_v17 = vsel %vm1399_vm2, %v1750_v4, %v1749_v57  ;;  %v3721_v14 = vsub.f32 %v3151_v63, %v3082_v51  ;;  %v3725_v6 = vsub.f32 %v3153_v27, %v3089_v33  ;;  %v4687_v51 = vld [vmem:[#allocation48_spill] sm:$0xff]  ;;  %v4691_v11 = vld [vmem:[#allocation89_spill] sm:$0xff]  ;;  %v4692_v4 = vld [vmem:[#allocation90_spill] sm:$0xff] }
  0xb8   : > { %v3729_v45 = vsub.f32 %v3157_v30, %v3095_v46  ;;  %v1753_v23 = vsel %vm1402_vm3, %v1752_v1, %v1751_v17  ;;  %v3734_v2 = vsub.f32 %v3162_v39, %v4683_v48  ;;  %v3738_v35 = vsub.f32 %v3171_v7, %v4685_v62  ;;  %v4693_v57 = vld [vmem:[#allocation91_spill] sm:$0xff]  ;;  %v4694_v48 = vld [vmem:[#allocation92_spill] sm:$0xff]  ;;  %v4695_v62 = vld [vmem:[#allocation93_spill] sm:$0xff] }
  0xb9   : > { %4679 = vst [vmem:[#allocation19_spill] sm:$0xff] %v3716_v9  ;;  %4680 = vst [vmem:[#allocation116_spill] sm:$0xff] %v3721_v14  ;;  %v3742_v28 = vsub.f32 %v3212_v43, %v4687_v51  ;;  %v1755_v33 = vsel %vm1405_vm4, %v1754_v60, %v1753_v23  ;;  %v610_v46 = vsub.f32 %v4689_v21, %v3326_v53  ;;  %v3763_v58 = vmul.f32 0.083333336, %v1354_v52 }
  0xba   : > { %4681 = vst [vmem:[#allocation117_spill] sm:$0xff] %v3725_v6  ;;  %4682 = vst [vmem:[#allocation118_spill] sm:$0xff] %v3729_v45  ;;  %v611_v3 = vsub.f32 %v3716_v9, %v4690_v25  ;;  %v612_v15 = vsub.f32 %v3721_v14, %v4691_v11  ;;  %v1757_v37 = vsel %vm1408_vm5, %v1756_v22, %v1755_v33 }
  0xbb   : > { %4684 = vst [vmem:[#allocation44_spill] sm:$0xff] %v3734_v2  ;;  %4686 = vst [vmem:[#allocation46_spill] sm:$0xff] %v3738_v35  ;;  %v613_v1 = vsub.f32 %v3725_v6, %v4692_v4  ;;  %v614_v17 = vsub.f32 %v3729_v45, %v4693_v57  ;;  %v615_v60 = vsub.f32 %v3734_v2, %v4694_v48  ;;  %v618_v7 = vmul.f32 0.071428575, %v610_v46 }
  0xbc   : > { %4688 = vst [vmem:[#allocation48_spill] sm:$0xff] %v3742_v28  ;;  %v1759_v23 = vsel %vm1411_vm6, %v1758_v59, %v1757_v37  ;;  %v616_v51 = vsub.f32 %v3738_v35, %v4695_v62  ;;  %v617_v43 = vsub.f32 %v3742_v28, %v4696_v50  ;;  %v619_v22 = vmul.f32 0.071428575, %v611_v3  ;;  %4697 = vst [vmem:[#allocation88_spill] sm:$0xff] %v3763_v58  ;;  %v4698_v3 = vld [vmem:[#allocation5_spill] sm:$0xff] }
  0xbd   : > { %v2671_v39 = vpack.i.bf16 %v1759_v23, %v1747_v0  ;;  %v620_v33 = vmul.f32 0.071428575, %v612_v15  ;;  %v621_v30 = vmul.f32 0.071428575, %v613_v1  ;;  %v622_v27 = vmul.f32 0.071428575, %v614_v17 }
  0xbe   : > { %v623_v63 = vmul.f32 0.071428575, %v615_v60  ;;  %v624_v54 = vmul.f32 0.071428575, %v616_v51  ;;  %v625_v13 = vmul.f32 0.071428575, %v617_v43  ;;  %v3772_v52 = vsub.f32 %v2975_v29, %v2913_v5 }
  0xbf   : > { %2672 = vrot.lane.b32.xlu1 %v2671_v39, %s2804_s29  ;;  %v1451_v59 = vrot.slane %v620_v33, 7  ;;  %v1453_v37 = vrot.slane %v621_v30, 6  ;;  %v1450_v8 = vrot.slane %v618_v7, 1  ;;  %v1455_v55 = vrot.slane %v622_v27, 5  ;;  %v4699_v15 = vld [vmem:[#allocation15_spill] sm:$0xff]  ;;  %v4702_v17 = vld [vmem:[#allocation22_spill] sm:$0xff] }
  0xc0   : > { %v1457_v47 = vrot.slane %v623_v63, 4  ;;  %v1459_v42 = vrot.slane %v624_v54, 3  ;;  %v1461_v0 = vrot.slane %v625_v13, 2  ;;  %v3768_v1 = vsub.f32 %v4699_v15, %v4698_v3  ;;  %v4701_v13 = vld [vmem:[#allocation20_spill] sm:$0xff]  ;;  %v4704_v51 = vld [vmem:[#allocation25_spill] sm:$0xff]  ;;  %v4705_v33 = vld [vmem:[#allocation26_spill] sm:$0xff] }
  0xc1   : > { %v1452_v46 = vsel %vm1396_vm1, %v1451_v59, %v619_v22  ;;  %v3777_v30 = vsub.f32 %v2977_v32, %v2917_v10  ;;  %v3781_v54 = vsub.f32 %v2979_v36, %v2921_v12  ;;  %v3785_v63 = vsub.f32 %v2987_v40, %v2925_v16  ;;  %v4700_v10 = vld [vmem:[#allocation13_spill] sm:$0xff]  ;;  %v4703_v23 = vld [vmem:[#allocation24_spill] sm:$0xff] }
  0xc2   : > { %v1454_v39 = vsel %vm1399_vm2, %v1453_v37, %v1452_v46  ;;  %v3790_v5 = vsub.f32 %v2992_v44, %v2929_v18  ;;  %v3794_v7 = vsub.f32 %v3025_v56, %v2933_v20  ;;  %v3798_v43 = vsub.f32 %v3066_v26, %v4700_v10  ;;  %v4706_v37 = vld [vmem:[#allocation27_spill] sm:$0xff]  ;;  %v4707_v3 = vld [vmem:[#allocation28_spill] sm:$0xff] }
  0xc3   : > { %v1456_v27 = vsel %vm1402_vm3, %v1455_v55, %v1454_v39  ;;  %v1162_v16 = vsub.f32 %v3768_v1, %v4678_v38  ;;  %v1163_v55 = vsub.f32 %v3772_v52, %v4701_v13  ;;  %v1164_v18 = vsub.f32 %v3777_v30, %v4702_v17 }
  0xc4   : > { %v1458_v12 = vsel %vm1405_vm4, %v1457_v47, %v1456_v27  ;;  %v1165_v20 = vsub.f32 %v3781_v54, %v4703_v23  ;;  %v1166_v22 = vsub.f32 %v3785_v63, %v4704_v51  ;;  %v1167_v47 = vsub.f32 %v3790_v5, %v4705_v33 }
  0xc5   : > { %v1460_v60 = vsel %vm1408_vm5, %v1459_v42, %v1458_v12  ;;  %v1168_v46 = vsub.f32 %v3794_v7, %v4706_v37  ;;  %v1169_v39 = vsub.f32 %v3798_v43, %v4707_v3  ;;  %v1170_v27 = vmul.f32 0.071428575, %v1162_v16 }
  0xc6   : > { %v1462_v59 = vsel %vm1411_vm6, %v1461_v0, %v1460_v60  ;;  %v1171_v42 = vmul.f32 0.071428575, %v1163_v55  ;;  %v1172_v12 = vmul.f32 0.071428575, %v1164_v18  ;;  %v1173_v15 = vmul.f32 0.071428575, %v1165_v20 }
  0xc7   : > { %v2676_v10 = vpack.i.bf16 %v1462_v59, %v1450_v8  ;;  %v1174_v26 = vmul.f32 0.071428575, %v1166_v22  ;;  %v1175_v56 = vmul.f32 0.071428575, %v1167_v47  ;;  %v1176_v44 = vmul.f32 0.071428575, %v1168_v46 }
  0xc8   : > { %v4708_v40 = vrot.slane %v3504_v49, 7  ;;  %v1177_v0 = vmul.f32 0.071428575, %v1169_v39  ;;  %v1477_v60 = vrot.slane %v1170_v27, 1  ;;  %v1478_v32 = vrot.slane %v1172_v12, 7  ;;  %v4709_v22 = vld [vmem:[#allocation58_spill] sm:$0xff] }
  0xc9   : > { %2677 = vrot.lane.b32.xlu0 %v2676_v10, %s2805_s9  ;;  %v1480_v29 = vrot.slane %v1173_v15, 6  ;;  %v1482_v16 = vrot.slane %v1174_v26, 5  ;;  %v1484_v8 = vrot.slane %v1175_v56, 4  ;;  %v1486_v55 = vrot.slane %v1176_v44, 3  ;;  %v4710_v59 = vld [vmem:[#allocation59_spill] sm:$0xff]  ;;  %v4711_v49 = vld [vmem:[#allocation60_spill] sm:$0xff] }
  0xca   : > { %v1322_v36 = vsub.f32 %v3768_v1, %v4708_v40  ;;  %v1479_v18 = vsel %vm1396_vm1, %v1478_v32, %v1171_v42  ;;  %v1488_v20 = vrot.slane %v1177_v0, 2  ;;  %v1307_v47 = vrot.slane %v4709_v22, 7  ;;  %v4712_v10 = vld [vmem:[#allocation61_spill] sm:$0xff]  ;;  %v4713_v27 = vld [vmem:[#allocation62_spill] sm:$0xff]  ;;  %v4714_v26 = vld [vmem:[#allocation63_spill] sm:$0xff] }
  0xcb   : > { %v1308_v46 = vrot.slane %v4710_v59, 7  ;;  %v1481_v40 = vsel %vm1399_vm2, %v1480_v29, %v1479_v18  ;;  %v1309_v24 = vrot.slane %v4711_v49, 7  ;;  %v1310_v39 = vrot.slane %v4712_v10, 7  ;;  %v4715_v44 = vld [vmem:[#allocation112_spill] sm:$0xff] }
  0xcc   : > { %v1330_v58 = vmul.f32 0.083333336, %v1322_v36  ;;  %v1311_v12 = vrot.slane %v4713_v27, 7  ;;  %v1483_v36 = vsel %vm1402_vm3, %v1482_v16, %v1481_v40  ;;  %v1312_v56 = vrot.slane %v4714_v26, 7 }
  0xcd   : > { %v1313_v15 = vrot.slane %v4715_v44, 7  ;;  %v1323_v32 = vsub.f32 %v3772_v52, %v1307_v47  ;;  %v1485_v42 = vsel %vm1405_vm4, %v1484_v8, %v1483_v36  ;;  %v1324_v0 = vsub.f32 %v3777_v30, %v1308_v46 }
  0xce   : > { %v1325_v29 = vsub.f32 %v3781_v54, %v1309_v24  ;;  %v1326_v18 = vsub.f32 %v3785_v63, %v1310_v39  ;;  %v1487_v10 = vsel %vm1408_vm5, %v1486_v55, %v1485_v42  ;;  %v1327_v27 = vsub.f32 %v3790_v5, %v1311_v12 }
  0xcf   : > { %v1328_v16 = vsub.f32 %v3794_v7, %v1312_v56  ;;  %v1329_v40 = vsub.f32 %v3798_v43, %v1313_v15  ;;  %v1489_v44 = vsel %vm1411_vm6, %v1488_v20, %v1487_v10  ;;  %v1331_v26 = vmul.f32 0.083333336, %v1323_v32  ;;  %v4716_v15 = vld [vmem:[#allocation95_spill] sm:$0xff]  ;;  %v4717_v32 = vld [vmem:[#allocation96_spill] sm:$0xff] }
  0xd0   : > { %v1332_v47 = vmul.f32 0.083333336, %v1324_v0  ;;  %v1333_v49 = vmul.f32 0.083333336, %v1325_v29  ;;  %v2681_v8 = vpack.i.bf16 %v1489_v44, %v1477_v60  ;;  %v1334_v36 = vmul.f32 0.083333336, %v1326_v18 }
  0xd1   : > { %v1335_v46 = vmul.f32 0.083333336, %v1327_v27  ;;  %v1336_v59 = vmul.f32 0.083333336, %v1328_v16  ;;  %v1337_v24 = vmul.f32 0.083333336, %v1329_v40 }
  0xd2   : > { %v1896_v22 = vrot.slane %v1331_v26, 7  ;;  %v1898_v39 = vrot.slane %v1332_v47, 6  ;;  %v1900_v3 = vrot.slane %v1333_v49, 5  ;;  %2682 = vrot.lane.b32.xlu1 %v2681_v8, %s2806_s10  ;;  %v1902_v55 = vrot.slane %v1334_v36, 4  ;;  %v4718_v44 = vld [vmem:[#allocation97_spill] sm:$0xff]  ;;  %v4719_v26 = vld [vmem:[#allocation98_spill] sm:$0xff] }
  0xd3   : > { %v1904_v12 = vrot.slane %v1335_v46, 3  ;;  %v1906_v56 = vrot.slane %v1336_v59, 2  ;;  %v666_v42 = vrot.slane %v4716_v15, 7  ;;  %v1908_v10 = vrot.slane %v1337_v24, 1  ;;  %v4720_v49 = vld [vmem:[#allocation99_spill] sm:$0xff]  ;;  %v4721_v16 = vld [vmem:[#allocation100_spill] sm:$0xff] }
  0xd4   : > { %v1897_v20 = vsel %vm1396_vm1, %v1896_v22, %v1330_v58  ;;  %v667_v60 = vrot.slane %v4717_v32, 7  ;;  %v668_v27 = vrot.slane %v4718_v44, 7  ;;  %v669_v29 = vrot.slane %v4719_v26, 7  ;;  %v4722_v59 = vld [vmem:[#allocation101_spill] sm:$0xff]  ;;  %v4723_v36 = vld [vmem:[#allocation102_spill] sm:$0xff] }
  0xd5   : > { %v1899_v0 = vsel %vm1399_vm2, %v1898_v39, %v1897_v20  ;;  %v670_v18 = vrot.slane %v4720_v49, 7  ;;  %v671_v40 = vrot.slane %v4721_v16, 7  ;;  %v672_v8 = vrot.slane %v4722_v59, 7 }
  0xd6   : > { %v1901_v47 = vsel %vm1402_vm3, %v1900_v3, %v1899_v0  ;;  %v673_v46 = vrot.slane %v4723_v36, 7  ;;  %v682_v58 = vsub.f32 %v4689_v21, %v666_v42  ;;  %v683_v24 = vsub.f32 %v3716_v9, %v667_v60 }
  0xd7   : > { %v1903_v22 = vsel %vm1405_vm4, %v1902_v55, %v1901_v47  ;;  %v684_v39 = vsub.f32 %v3721_v14, %v668_v27  ;;  %v685_v20 = vsub.f32 %v3725_v6, %v669_v29  ;;  %v686_v16 = vsub.f32 %v3729_v45, %v670_v18  ;;  %v4724_v6 = vld [vmem:[#allocation64_spill] sm:$0xff] }
  0xd8   : > { %v1905_v15 = vsel %vm1408_vm5, %v1904_v12, %v1903_v22  ;;  %v687_v3 = vsub.f32 %v3734_v2, %v671_v40  ;;  %v688_v0 = vsub.f32 %v3738_v35, %v672_v8  ;;  %v689_v59 = vsub.f32 %v3742_v28, %v673_v46 }
  0xd9   : > { %v1907_v36 = vsel %vm1411_vm6, %v1906_v56, %v1905_v15  ;;  %v690_v49 = vmul.f32 0.07692308, %v682_v58  ;;  %v691_v55 = vmul.f32 0.07692308, %v683_v24  ;;  %v692_v26 = vmul.f32 0.07692308, %v684_v39 }
  0xda   : > { %v1909_v47 = vsel %vm1885_vm7, %v1908_v10, %v1907_v36  ;;  %v693_v21 = vmul.f32 0.07692308, %v685_v20  ;;  %v694_v14 = vmul.f32 0.07692308, %v686_v16  ;;  %v695_v12 = vmul.f32 0.07692308, %v687_v3 }
  0xdb   : > { %1910 = vrot.lane.b32.xlu0 %v1909_v47, %s2798_s17  ;;  %v696_v22 = vmul.f32 0.07692308, %v688_v0  ;;  %v697_v45 = vmul.f32 0.07692308, %v689_v59  ;;  %v786_v2 = vsub.f32 %v4724_v6, %v666_v42  ;;  %v1612_v44 = vrot.slane %v690_v49, 1  ;;  %v4725_v36 = vld [vmem:[#allocation65_spill] sm:$0xff] }
  0xdc   : > { %v1613_v35 = vrot.slane %v692_v26, 7  ;;  %v1615_v32 = vrot.slane %v693_v21, 6  ;;  %v1617_v56 = vrot.slane %v694_v14, 5  ;;  %v1619_v28 = vrot.slane %v695_v12, 4  ;;  %v4726_v16 = vld [vmem:[#allocation66_spill] sm:$0xff]  ;;  %v4727_v47 = vld [vmem:[#allocation67_spill] sm:$0xff] }
  0xdd   : > { %v794_v15 = vmul.f32 0.083333336, %v786_v2  ;;  %v1621_v58 = vrot.slane %v696_v22, 3  ;;  %v1623_v24 = vrot.slane %v697_v45, 2  ;;  %v787_v39 = vsub.f32 %v4725_v36, %v667_v60  ;;  %v4728_v0 = vld [vmem:[#allocation68_spill] sm:$0xff]  ;;  %v4729_v49 = vld [vmem:[#allocation70_spill] sm:$0xff] }
  0xde   : > { %v1614_v10 = vsel %vm1396_vm1, %v1613_v35, %v691_v55  ;;  %v788_v20 = vsub.f32 %v4726_v16, %v668_v27  ;;  %v789_v3 = vsub.f32 %v4727_v47, %v669_v29  ;;  %v790_v42 = vsub.f32 %v4728_v0, %v670_v18  ;;  %v4730_v21 = vld [vmem:[#allocation71_spill] sm:$0xff]  ;;  %v4731_v12 = vld [vmem:[#allocation72_spill] sm:$0xff] }
  0xdf   : > { %v1616_v59 = vsel %vm1399_vm2, %v1615_v32, %v1614_v10  ;;  %v791_v26 = vsub.f32 %v4729_v49, %v671_v40  ;;  %v792_v14 = vsub.f32 %v4730_v21, %v672_v8  ;;  %v793_v45 = vsub.f32 %v4731_v12, %v673_v46 }
  0xe0   : > { %v1618_v2 = vsel %vm1402_vm3, %v1617_v56, %v1616_v59  ;;  %v795_v22 = vmul.f32 0.083333336, %v787_v39  ;;  %v796_v35 = vmul.f32 0.083333336, %v788_v20  ;;  %v797_v55 = vmul.f32 0.083333336, %v789_v3 }
  0xe1   : > { %v1620_v60 = vsel %vm1405_vm4, %v1619_v28, %v1618_v2  ;;  %v798_v27 = vmul.f32 0.083333336, %v790_v42  ;;  %v799_v9 = vmul.f32 0.083333336, %v791_v26  ;;  %v800_v32 = vmul.f32 0.083333336, %v792_v14 }
  0xe2   : > { %v1622_v29 = vsel %vm1408_vm5, %v1621_v58, %v1620_v60  ;;  %v801_v10 = vmul.f32 0.083333336, %v793_v45  ;;  %v1921_v18 = vrot.slane %v795_v22, 7  ;;  %v1923_v37 = vrot.slane %v796_v35, 6  ;;  %v4732_v59 = vld [vmem:[#allocation29_spill] sm:$0xff]  ;;  %v4733_v26 = vld [vmem:[#allocation30_spill] sm:$0xff] }
  0xe3   : > { %v1624_v40 = vsel %vm1411_vm6, %v1623_v24, %v1622_v29  ;;  %v1925_v8 = vrot.slane %v797_v55, 5  ;;  %v1927_v33 = vrot.slane %v798_v27, 4  ;;  %v1929_v39 = vrot.slane %v799_v9, 3  ;;  %v4734_v24 = vld [vmem:[#allocation31_spill] sm:$0xff]  ;;  %v4735_v45 = vld [vmem:[#allocation32_spill] sm:$0xff]  ;;  %v4739_v27 = vld [vmem:[#allocation37_spill] sm:$0xff] }
  0xe4   : > { %v2686_v56 = vpack.i.bf16 %v1624_v40, %v1612_v44  ;;  %v1922_v46 = vsel %vm1396_vm1, %v1921_v18, %v794_v15  ;;  %v1931_v20 = vrot.slane %v800_v32, 2  ;;  %v1933_v3 = vrot.slane %v801_v10, 1  ;;  %v4736_v44 = vld [vmem:[#allocation34_spill] sm:$0xff]  ;;  %v4737_v15 = vld [vmem:[#allocation35_spill] sm:$0xff] }
  0xe5   : > { %v1924_v28 = vsel %vm1399_vm2, %v1923_v37, %v1922_v46  ;;  %v1218_v42 = vrot.slane %v4732_v59, 7  ;;  %v1219_v58 = vrot.slane %v4733_v26, 7  ;;  %v1220_v2 = vrot.slane %v4734_v24, 7  ;;  %v4738_v37 = vld [vmem:[#allocation36_spill] sm:$0xff] }
  0xe6   : > { %2687 = vrot.lane.b32.xlu1 %v2686_v56, %s2807_s11  ;;  %v1926_v14 = vsel %vm1402_vm3, %v1925_v8, %v1924_v28  ;;  %v1221_v22 = vrot.slane %v4735_v45, 7  ;;  %v1222_v35 = vrot.slane %v4736_v44, 7  ;;  %v1223_v60 = vrot.slane %v4737_v15, 7 }
  0xe7   : > { %v1928_v9 = vsel %vm1405_vm4, %v1927_v33, %v1926_v14  ;;  %v1224_v55 = vrot.slane %v4738_v37, 7  ;;  %v1225_v29 = vrot.slane %v4739_v27, 7  ;;  %v1234_v10 = vsub.f32 %v3768_v1, %v1218_v42  ;;  %v4740_v14 = vld [vmem:[#allocation80_spill] sm:$0xff] }
  0xe8   : > { %v1930_v32 = vsel %vm1408_vm5, %v1929_v39, %v1928_v9  ;;  %v1235_v18 = vsub.f32 %v3772_v52, %v1219_v58  ;;  %v1236_v40 = vsub.f32 %v3777_v30, %v1220_v2  ;;  %v1237_v56 = vsub.f32 %v3781_v54, %v1221_v22 }
  0xe9   : > { %v1932_v8 = vsel %vm1411_vm6, %v1931_v20, %v1930_v32  ;;  %v1238_v33 = vsub.f32 %v3785_v63, %v1222_v35  ;;  %v1239_v46 = vsub.f32 %v3790_v5, %v1223_v60  ;;  %v1240_v59 = vsub.f32 %v3794_v7, %v1224_v55  ;;  %v4741_v63 = vld [vmem:[#allocation81_spill] sm:$0xff] }
  0xea   : > { %v1934_v28 = vsel %vm1885_vm7, %v1933_v3, %v1932_v8  ;;  %v1241_v39 = vsub.f32 %v3798_v43, %v1225_v29  ;;  %v1242_v26 = vmul.f32 0.07692308, %v1234_v10  ;;  %v1243_v1 = vmul.f32 0.07692308, %v1235_v18  ;;  %v4742_v18 = vld [vmem:[#allocation82_spill] sm:$0xff]  ;;  %v4743_v8 = vld [vmem:[#allocation83_spill] sm:$0xff] }
  0xeb   : > { %1935 = vrot.lane.b32.xlu0 %v1934_v28, %s2805_s9  ;;  %v1244_v52 = vmul.f32 0.07692308, %v1236_v40  ;;  %v1245_v30 = vmul.f32 0.07692308, %v1237_v56  ;;  %v1338_v20 = vsub.f32 %v4740_v14, %v1218_v42  ;;  %v1246_v24 = vmul.f32 0.07692308, %v1238_v33 }
  0xec   : > { %v1247_v54 = vmul.f32 0.07692308, %v1239_v46  ;;  %v1248_v45 = vmul.f32 0.07692308, %v1240_v59  ;;  %v1339_v44 = vsub.f32 %v4741_v63, %v1219_v58  ;;  %v1249_v5 = vmul.f32 0.07692308, %v1241_v39 }
  0xed   : > { %v1346_v9 = vmul.f32 0.083333336, %v1338_v20  ;;  %v1639_v3 = vrot.slane %v1242_v26, 1  ;;  %v1640_v15 = vrot.slane %v1244_v52, 7  ;;  %v1642_v7 = vrot.slane %v1245_v30, 6  ;;  %v4744_v33 = vld [vmem:[#allocation84_spill] sm:$0xff] }
  0xee   : > { %v1644_v37 = vrot.slane %v1246_v24, 5  ;;  %v1646_v43 = vrot.slane %v1247_v54, 4  ;;  %v1648_v27 = vrot.slane %v1248_v45, 3  ;;  %v1650_v10 = vrot.slane %v1249_v5, 2  ;;  %v4745_v58 = vld [vmem:[#allocation85_spill] sm:$0xff]  ;;  %v4746_v59 = vld [vmem:[#allocation86_spill] sm:$0xff] }
  0xef   : > { %v1641_v32 = vsel %vm1396_vm1, %v1640_v15, %v1243_v1  ;;  %v1340_v40 = vsub.f32 %v4742_v18, %v1220_v2  ;;  %v1341_v42 = vsub.f32 %v4743_v8, %v1221_v22  ;;  %v1342_v46 = vsub.f32 %v4744_v33, %v1222_v35  ;;  %v4747_v52 = vld [vmem:[#allocation87_spill] sm:$0xff] }
  0xf0   : > { %v1643_v56 = vsel %vm1399_vm2, %v1642_v7, %v1641_v32  ;;  %v1343_v28 = vsub.f32 %v4745_v58, %v1223_v60  ;;  %v1344_v39 = vsub.f32 %v4746_v59, %v1224_v55  ;;  %v1345_v30 = vsub.f32 %v4747_v52, %v1225_v29 }
  0xf1   : > { %v1645_v26 = vsel %vm1402_vm3, %v1644_v37, %v1643_v56  ;;  %v1347_v20 = vmul.f32 0.083333336, %v1339_v44  ;;  %v1348_v24 = vmul.f32 0.083333336, %v1340_v40  ;;  %v1349_v54 = vmul.f32 0.083333336, %v1341_v42 }
  0xf2   : > { %v1647_v1 = vsel %vm1405_vm4, %v1646_v43, %v1645_v26  ;;  %v1350_v2 = vmul.f32 0.083333336, %v1342_v46  ;;  %v1351_v45 = vmul.f32 0.083333336, %v1343_v28  ;;  %v1352_v5 = vmul.f32 0.083333336, %v1344_v39 }
  0xf3   : > { %v1649_v22 = vsel %vm1408_vm5, %v1648_v27, %v1647_v1  ;;  %v1353_v15 = vmul.f32 0.083333336, %v1345_v30  ;;  %v1946_v35 = vrot.slane %v1347_v20, 7  ;;  %v1948_v7 = vrot.slane %v1348_v24, 6 }
  0xf4   : > { %v1651_v60 = vsel %vm1411_vm6, %v1650_v10, %v1649_v22  ;;  %v1950_v55 = vrot.slane %v1349_v54, 5  ;;  %v1952_v32 = vrot.slane %v1350_v2, 4  ;;  %v1954_v44 = vrot.slane %v1351_v45, 3 }
  0xf5   : > { %v2691_v37 = vpack.i.bf16 %v1651_v60, %v1639_v3  ;;  %v1947_v29 = vsel %vm1396_vm1, %v1946_v35, %v1346_v9  ;;  %v1956_v40 = vrot.slane %v1352_v5, 2  ;;  %v1958_v42 = vrot.slane %v1353_v15, 1 }
  0xf6   : > { %v1949_v43 = vsel %vm1399_vm2, %v1948_v7, %v1947_v29  ;;  %v698_v56 = vsub.f32 %v4724_v6, %v3326_v53  ;;  %v699_v27 = vsub.f32 %v4725_v36, %v4690_v25  ;;  %v700_v3 = vsub.f32 %v4726_v16, %v4691_v11  ;;  %v4749_v29 = vld [vmem:[#allocation74_spill] sm:$0xff] }
  0xf7   : > { %2692 = vrot.lane.b32.xlu1 %v2691_v37, %s2808_s12  ;;  %v1951_v10 = vsel %vm1402_vm3, %v1950_v55, %v1949_v43  ;;  %v701_v9 = vsub.f32 %v4727_v47, %v4692_v4  ;;  %v702_v46 = vsub.f32 %v4728_v0, %v4693_v57  ;;  %v703_v53 = vsub.f32 %v4729_v49, %v4694_v48 }
  0xf8   : > { %v1953_v28 = vsel %vm1405_vm4, %v1952_v32, %v1951_v10  ;;  %v704_v6 = vsub.f32 %v4730_v21, %v4695_v62  ;;  %v705_v36 = vsub.f32 %v4731_v12, %v4696_v50  ;;  %v706_v16 = vmul.f32 0.07692308, %v698_v56  ;;  %v4748_v32 = vld [vmem:[#allocation73_spill] sm:$0xff] }
  0xf9   : > { %v1955_v39 = vsel %vm1408_vm5, %v1954_v44, %v1953_v28  ;;  %v707_v26 = vmul.f32 0.07692308, %v699_v27  ;;  %v708_v30 = vmul.f32 0.07692308, %v700_v3  ;;  %v709_v20 = vmul.f32 0.07692308, %v701_v9 }
  0xfa   : > { %v1957_v47 = vsel %vm1411_vm6, %v1956_v40, %v1955_v39  ;;  %v710_v0 = vmul.f32 0.07692308, %v702_v46  ;;  %v711_v24 = vmul.f32 0.07692308, %v703_v53  ;;  %v712_v54 = vmul.f32 0.07692308, %v704_v6 }
  0xfb   : > { %v1959_v1 = vsel %vm1885_vm7, %v1958_v42, %v1957_v47  ;;  %v713_v49 = vmul.f32 0.07692308, %v705_v36  ;;  %v1666_v2 = vrot.slane %v706_v16, 1  ;;  %v1667_v21 = vrot.slane %v708_v30, 7 }
  0xfc   : > { %1960 = vrot.lane.b32.xlu0 %v1959_v1, %s2806_s10  ;;  %v1669_v45 = vrot.slane %v709_v20, 6  ;;  %v1671_v12 = vrot.slane %v710_v0, 5  ;;  %v1673_v22 = vrot.slane %v711_v24, 4  ;;  %v1675_v5 = vrot.slane %v712_v54, 3  ;;  %v4751_v0 = vld [vmem:[#allocation26_spill] sm:$0xff]  ;;  %v4753_v1 = vld [vmem:[#allocation28_spill] sm:$0xff] }
  0xfd   : > { %v1677_v15 = vrot.slane %v713_v49, 2  ;;  %v803_v35 = vsub.f32 %v3564_v41, %v4690_v25  ;;  %v804_v60 = vsub.f32 %v3619_v34, %v4691_v11  ;;  %v1668_v7 = vsel %vm1396_vm1, %v1667_v21, %v707_v26  ;;  %v4750_v41 = vld [vmem:[#allocation75_spill] sm:$0xff] }
  0xfe   : > { %v805_v55 = vsub.f32 %v3628_v61, %v4692_v4  ;;  %v806_v37 = vsub.f32 %v4748_v32, %v4693_v57  ;;  %v807_v44 = vsub.f32 %v4749_v29, %v4694_v48  ;;  %v1670_v40 = vsel %vm1399_vm2, %v1669_v45, %v1668_v7 }
  0xff   : > { %v808_v43 = vsub.f32 %v3642_v19, %v4695_v62  ;;  %v809_v25 = vsub.f32 %v4750_v41, %v4696_v50  ;;  %v811_v34 = vmul.f32 0.083333336, %v803_v35  ;;  %v1672_v11 = vsel %vm1402_vm3, %v1671_v12, %v1670_v40 }
 0x100   : > { %v812_v42 = vmul.f32 0.083333336, %v804_v60  ;;  %v813_v56 = vmul.f32 0.083333336, %v805_v55  ;;  %v814_v61 = vmul.f32 0.083333336, %v806_v37  ;;  %v1674_v4 = vsel %vm1405_vm4, %v1673_v22, %v1672_v11 }
 0x101   : > { %v815_v57 = vmul.f32 0.083333336, %v807_v44  ;;  %v816_v27 = vmul.f32 0.083333336, %v808_v43  ;;  %v817_v10 = vmul.f32 0.083333336, %v809_v25  ;;  %v1676_v48 = vsel %vm1408_vm5, %v1675_v5, %v1674_v4 }
 0x102   : > { %v1971_v3 = vrot.slane %v811_v34, 7  ;;  %v1973_v9 = vrot.slane %v812_v42, 6  ;;  %v1975_v46 = vrot.slane %v813_v56, 5  ;;  %v1678_v19 = vsel %vm1411_vm6, %v1677_v15, %v1676_v48  ;;  %v4754_v37 = vld [vmem:[#allocation76_spill] sm:$0xff]  ;;  %v4755_v44 = vld [vmem:[#allocation77_spill] sm:$0xff]  ;;  %v4756_v43 = vld [vmem:[#allocation78_spill] sm:$0xff] }
 0x103   : > { %v1977_v62 = vrot.slane %v814_v61, 4  ;;  %v1979_v50 = vrot.slane %v815_v57, 3  ;;  %v1981_v28 = vrot.slane %v816_v27, 2  ;;  %v2696_v53 = vpack.i.bf16 %v1678_v19, %v1666_v2  ;;  %v4757_v34 = vld [vmem:[#allocation79_spill] sm:$0xff]  ;;  %v4758_v42 = vld [vmem:[#allocation113_spill] sm:$0xff]  ;;  %v4759_v61 = vld [vmem:[#allocation114_spill] sm:$0xff] }
 0x104   : > { %v1972_v6 = vsel %vm1396_vm1, %v1971_v3, %v3709_v31  ;;  %v1983_v36 = vrot.slane %v817_v10, 1  ;;  %v1250_v39 = vsub.f32 %v4740_v14, %v4678_v38  ;;  %v1251_v26 = vsub.f32 %v4741_v63, %v4701_v13  ;;  %v4752_v14 = vld [vmem:[#allocation27_spill] sm:$0xff] }
 0x105   : > { %v1974_v16 = vsel %vm1399_vm2, %v1973_v9, %v1972_v6  ;;  %v1252_v30 = vsub.f32 %v4742_v18, %v4702_v17  ;;  %v1253_v47 = vsub.f32 %v4743_v8, %v4703_v23  ;;  %2697 = vrot.lane.b32.xlu1 %v2696_v53, %s2809_s13  ;;  %v1254_v31 = vsub.f32 %v4744_v33, %v4704_v51 }
 0x106   : > { %v1976_v20 = vsel %vm1402_vm3, %v1975_v46, %v1974_v16  ;;  %v1255_v38 = vsub.f32 %v4745_v58, %v4751_v0  ;;  %v1256_v24 = vsub.f32 %v4746_v59, %v4752_v14  ;;  %v1257_v18 = vsub.f32 %v4747_v52, %v4753_v1 }
 0x107   : > { %v1978_v63 = vsel %vm1405_vm4, %v1977_v62, %v1976_v20  ;;  %v1258_v54 = vmul.f32 0.07692308, %v1250_v39  ;;  %v1259_v8 = vmul.f32 0.07692308, %v1251_v26  ;;  %v1260_v2 = vmul.f32 0.07692308, %v1252_v30 }
 0x108   : > { %v1980_v49 = vsel %vm1408_vm5, %v1979_v50, %v1978_v63  ;;  %v1261_v21 = vmul.f32 0.07692308, %v1253_v47  ;;  %v1262_v45 = vmul.f32 0.07692308, %v1254_v31  ;;  %v1263_v12 = vmul.f32 0.07692308, %v1255_v38 }
 0x109   : > { %v1982_v33 = vsel %vm1411_vm6, %v1981_v28, %v1980_v49  ;;  %v1264_v22 = vmul.f32 0.07692308, %v1256_v24  ;;  %v1265_v58 = vmul.f32 0.07692308, %v1257_v18  ;;  %v1693_v59 = vrot.slane %v1258_v54, 1  ;;  %v4761_v39 = vld [vmem:[#allocation88_spill] sm:$0xff] }
 0x10a   : > { %v1984_v5 = vsel %vm1885_vm7, %v1983_v36, %v1982_v33  ;;  %v1694_v15 = vrot.slane %v1260_v2, 7  ;;  %v1696_v35 = vrot.slane %v1261_v21, 6  ;;  %v1698_v52 = vrot.slane %v1262_v45, 5  ;;  %v4762_v31 = vld [vmem:[#allocation39_spill] sm:$0xff]  ;;  %v4763_v38 = vld [vmem:[#allocation40_spill] sm:$0xff]  ;;  %v4764_v63 = vld [vmem:[#allocation41_spill] sm:$0xff] }
 0x10b   : > { %1985 = vrot.lane.b32.xlu0 %v1984_v5, %s2799_s18  ;;  %v1700_v60 = vrot.slane %v1263_v12, 4  ;;  %v1702_v7 = vrot.slane %v1264_v22, 3  ;;  %v1704_v55 = vrot.slane %v1265_v58, 2  ;;  %v1355_v29 = vsub.f32 %v4754_v37, %v4701_v13  ;;  %v4760_v13 = vld [vmem:[#allocation115_spill] sm:$0xff]  ;;  %v4765_v18 = vld [vmem:[#allocation42_spill] sm:$0xff]  ;;  %v4767_v21 = vld [vmem:[#allocation45_spill] sm:$0xff] }
 0x10c   : > { %v1695_v32 = vsel %vm1396_vm1, %v1694_v15, %v1259_v8  ;;  %v1356_v40 = vsub.f32 %v4755_v44, %v4702_v17  ;;  %v1357_v41 = vsub.f32 %v4756_v43, %v4703_v23  ;;  %v1358_v11 = vsub.f32 %v4757_v34, %v4704_v51  ;;  %v4766_v8 = vld [vmem:[#allocation43_spill] sm:$0xff]  ;;  %v4769_v22 = vld [vmem:[#allocation49_spill] sm:$0xff]  ;;  %s2812_s18 = smov 120  }
 0x10d   : > { %v1697_v25 = vsel %vm1399_vm2, %v1696_v35, %v1695_v32  ;;  %v1359_v56 = vsub.f32 %v4758_v42, %v4751_v0  ;;  %v1360_v4 = vsub.f32 %v4759_v61, %v4752_v14  ;;  %v1361_v27 = vsub.f32 %v4760_v13, %v4753_v1  ;;  %v4768_v33 = vld [vmem:[#allocation47_spill] sm:$0xff]  ;;  %v4771_v35 = vld [vmem:[#allocation105_spill] sm:$0xff] }
 0x10e   : > { %v1699_v57 = vsel %vm1402_vm3, %v1698_v52, %v1697_v25  ;;  %v1363_v17 = vmul.f32 0.083333336, %v1355_v29  ;;  %v1364_v10 = vmul.f32 0.083333336, %v1356_v40  ;;  %v1365_v48 = vmul.f32 0.083333336, %v1357_v41 }
 0x10f   : > { %v1701_v23 = vsel %vm1405_vm4, %v1700_v60, %v1699_v57  ;;  %v1366_v3 = vmul.f32 0.083333336, %v1358_v11  ;;  %v1367_v9 = vmul.f32 0.083333336, %v1359_v56  ;;  %v1368_v46 = vmul.f32 0.083333336, %v1360_v4 }
 0x110   : > { %v1703_v51 = vsel %vm1408_vm5, %v1702_v7, %v1701_v23  ;;  %v1369_v19 = vmul.f32 0.083333336, %v1361_v27  ;;  %v1996_v62 = vrot.slane %v1363_v17, 7  ;;  %v1998_v28 = vrot.slane %v1364_v10, 6  ;;  %v4772_v7 = vld [vmem:[#allocation106_spill] sm:$0xff]  ;;  %v4773_v32 = vld [vmem:[#allocation107_spill] sm:$0xff] }
 0x111   : > { %v1705_v50 = vsel %vm1411_vm6, %v1704_v55, %v1703_v51  ;;  %v2000_v53 = vrot.slane %v1365_v48, 5  ;;  %v2002_v6 = vrot.slane %v1366_v3, 4  ;;  %v2004_v26 = vrot.slane %v1367_v9, 3  ;;  %v4774_v29 = vld [vmem:[#allocation108_spill] sm:$0xff]  ;;  %v4775_v43 = vld [vmem:[#allocation103_spill] sm:$0xff]  ;;  %v4776_v25 = vld [vmem:[#allocation109_spill] sm:$0xff] }
 0x112   : > { %v2701_v36 = vpack.i.bf16 %v1705_v50, %v1693_v59  ;;  %v1997_v16 = vsel %vm1396_vm1, %v1996_v62, %v4761_v39  ;;  %v2006_v30 = vrot.slane %v1368_v46, 2  ;;  %v2008_v20 = vrot.slane %v1369_v19, 1  ;;  %v4770_v59 = vld [vmem:[#allocation104_spill] sm:$0xff]  ;;  %v4777_v11 = vld [vmem:[#allocation110_spill] sm:$0xff]  ;;  %v4778_v56 = vld [vmem:[#allocation51_spill] sm:$0xff] }
 0x113   : > { %v1999_v47 = vsel %vm1399_vm2, %v1998_v28, %v1997_v16  ;;  %v538_v0 = vrot.slane %v4762_v31, 5  ;;  %v539_v14 = vrot.slane %v4763_v38, 5  ;;  %v540_v1 = vrot.slane %v4764_v63, 5  ;;  %v4779_v4 = vld [vmem:[#allocation52_spill] sm:$0xff]  ;;  %v4780_v13 = vld [vmem:[#allocation53_spill] sm:$0xff]  ;;  %v4781_v17 = vld [vmem:[#allocation54_spill] sm:$0xff] }
 0x114   : > { %2702 = vrot.lane.b32.xlu1 %v2701_v36, %s2810_s14  ;;  %v2001_v24 = vsel %vm1402_vm3, %v2000_v53, %v1999_v47  ;;  %v541_v54 = vrot.slane %v4765_v18, 5  ;;  %v542_v49 = vrot.slane %v4766_v8, 5  ;;  %v543_v45 = vrot.slane %v4767_v21, 5  ;;  %v4782_v23 = vld [vmem:[#allocation55_spill] sm:$0xff]  ;;  %v4783_v3 = vld [vmem:[#allocation57_spill] sm:$0xff]  ;;  %v4785_v28 = vld [vmem:[#allocation50_spill] sm:$0xff] }
 0x115   : > { %v2003_v2 = vsel %vm1405_vm4, %v2002_v6, %v2001_v24  ;;  %v544_v12 = vrot.slane %v4768_v33, 5  ;;  %v545_v58 = vrot.slane %v4769_v22, 5  ;;  %v555_v15 = vadd.f32 %v539_v14, %v4770_v59  ;;  %v4784_v51 = vld [vmem:[#allocation69_spill] sm:$0xff]  ;;  %v4786_v38 = vld [vmem:[#allocation6_spill] sm:$0xff]  ;;  %s263_s14 = sand.u32 1, %s2788_s22  }
 0x116   : > { %v2005_v5 = vsel %vm1408_vm5, %v2004_v26, %v2003_v2  ;;  %v556_v52 = vadd.f32 %v540_v1, %v4771_v35  ;;  %v557_v55 = vadd.f32 %v541_v54, %v4772_v7  ;;  %v558_v37 = vadd.f32 %v542_v49, %v4773_v32  ;;  %v4787_v1 = vld [vmem:[#allocation7_spill] sm:$0xff]  ;;  %v4788_v54 = vld [vmem:[#allocation8_spill] sm:$0xff]  ;;  %v4789_v2 = vld [vmem:[#allocation9_spill] sm:$0xff]  ;;  %s2353_s9 = scalar_lea.sflag [#allocation3], %s263_s14 }
 0x117   : > { %v2007_v60 = vsel %vm1411_vm6, %v2006_v30, %v2005_v5  ;;  %v559_v44 = vadd.f32 %v543_v45, %v4774_v29  ;;  %v554_v41 = vadd.f32 %v538_v0, %v4775_v43  ;;  %v560_v34 = vadd.f32 %v544_v12, %v4776_v25  ;;  %v4790_v45 = vld [vmem:[#allocation10_spill] sm:$0xff]  ;;  %v4791_v12 = vld [vmem:[#allocation11_spill] sm:$0xff] }
 0x118   : > { %v2009_v40 = vsel %vm1885_vm7, %v2008_v20, %v2007_v60  ;;  %v561_v42 = vadd.f32 %v545_v58, %v4777_v11  ;;  %v731_v61 = vsub.f32 %v4778_v56, %v555_v15  ;;  %v732_v57 = vsub.f32 %v4779_v4, %v556_v52  ;;  %v4792_v15 = vld [vmem:[#allocation12_spill] sm:$0xff]  ;;  %v4793_v60 = vld [vmem:[#allocation14_spill] sm:$0xff] }
 0x119   : > { %2010 = vrot.lane.b32.xlu0 %v2009_v40, %s2800_s19  ;;  %v733_v27 = vsub.f32 %v4780_v13, %v557_v55  ;;  %v734_v10 = vsub.f32 %v4781_v17, %v558_v37  ;;  %v735_v48 = vsub.f32 %v4782_v23, %v559_v44  ;;  %v736_v9 = vsub.f32 %v4783_v3, %v560_v34  ;;  %v4794_v44 = vld [vmem:[#allocation58_spill] sm:$0xff] }
 0x11a   : > { %v737_v46 = vsub.f32 %v4784_v51, %v561_v42  ;;  %v739_v19 = vmul.f32 0.083333336, %v731_v61  ;;  %v740_v62 = vmul.f32 0.083333336, %v732_v57  ;;  %v730_v53 = vsub.f32 %v4785_v28, %v554_v41  ;;  %v4795_v41 = vld [vmem:[#allocation59_spill] sm:$0xff]  ;;  %v4796_v42 = vld [vmem:[#allocation60_spill] sm:$0xff] }
 0x11b   : > { %v741_v50 = vmul.f32 0.083333336, %v733_v27  ;;  %v742_v6 = vmul.f32 0.083333336, %v734_v10  ;;  %v743_v36 = vmul.f32 0.083333336, %v735_v48 }
 0x11c   : > { %v744_v39 = vmul.f32 0.083333336, %v736_v9  ;;  %v745_v16 = vmul.f32 0.083333336, %v737_v46  ;;  %v1774_v26 = vrot.slane %v739_v19, 7  ;;  %v1775_v30 = vrot.slane %v740_v62, 6 }
 0x11d   : > { %v1777_v47 = vrot.slane %v741_v50, 5  ;;  %v1779_v20 = vrot.slane %v742_v6, 4  ;;  %v1781_v31 = vrot.slane %v743_v36, 3  ;;  %v1090_v14 = vrot.slane %v4786_v38, 5  ;;  %v4797_v27 = vld [vmem:[#allocation61_spill] sm:$0xff]  ;;  %v4798_v48 = vld [vmem:[#allocation62_spill] sm:$0xff] }
 0x11e   : > { %v1783_v0 = vrot.slane %v744_v39, 2  ;;  %v1776_v24 = vsel %vm1396_vm1, %v1775_v30, %v1774_v26  ;;  %v1785_v63 = vrot.slane %v745_v16, 1  ;;  %v1091_v18 = vrot.slane %v4787_v1, 5  ;;  %v4799_v46 = vld [vmem:[#allocation63_spill] sm:$0xff]  ;;  %v4800_v50 = vld [vmem:[#allocation56_spill] sm:$0xff]  ;;  %v4803_v30 = vld [vmem:[#allocation17_spill] sm:$0xff] }
 0x11f   : > { %v1092_v8 = vrot.slane %v4788_v54, 5  ;;  %v1778_v49 = vsel %vm1399_vm2, %v1777_v47, %v1776_v24  ;;  %v1093_v21 = vrot.slane %v4789_v2, 5  ;;  %v1094_v33 = vrot.slane %v4790_v45, 5  ;;  %v4801_v6 = vld [vmem:[#allocation112_spill] sm:$0xff]  ;;  %v4806_v24 = vld [vmem:[#allocation23_spill] sm:$0xff] }
 0x120   : > { %v1095_v22 = vrot.slane %v4791_v12, 5  ;;  %v738_v58 = vmul.f32 0.083333336, %v730_v53  ;;  %v1780_v5 = vsel %vm1402_vm3, %v1779_v20, %v1778_v49  ;;  %v1096_v52 = vrot.slane %v4792_v15, 5  ;;  %v4802_v39 = vld [vmem:[#allocation16_spill] sm:$0xff]  ;;  %v4804_v20 = vld [vmem:[#allocation18_spill] sm:$0xff] }
 0x121   : > { %v1097_v55 = vrot.slane %v4793_v60, 5  ;;  %v1782_v37 = vsel %vm1405_vm4, %v1781_v31, %v1780_v5  ;;  %v1107_v40 = vadd.f32 %v1091_v18, %v4794_v44  ;;  %v1108_v34 = vadd.f32 %v1092_v8, %v4795_v41  ;;  %v4807_v18 = vld [vmem:[#allocation33_spill] sm:$0xff]  ;;  %v4808_v8 = vld [vmem:[#allocation38_spill] sm:$0xff] }
 0x122   : > { %v1109_v61 = vadd.f32 %v1093_v21, %v4796_v42  ;;  %v1784_v57 = vsel %vm1408_vm5, %v1783_v0, %v1782_v37  ;;  %v1110_v10 = vadd.f32 %v1094_v33, %v4797_v27  ;;  %v1111_v9 = vadd.f32 %v1095_v22, %v4798_v48  ;;  %v4805_v0 = vld [vmem:[#allocation21_spill] sm:$0xff]  ;;  %v4809_v21 = vld [vmem:[#allocation15_spill] sm:$0xff]  ;;  %v2716_v48 = vld [vmem:[%s4300_s2 + $0x38] sm:$0xff]  }
 0x123   : > { %v1112_v19 = vadd.f32 %v1096_v52, %v4799_v46  ;;  %v1786_v62 = vsel %vm1411_vm6, %v1785_v63, %v1784_v57  ;;  %v1106_v53 = vadd.f32 %v1090_v14, %v4800_v50  ;;  %v1113_v36 = vadd.f32 %v1097_v55, %v4801_v6  ;;  %v2717_v46 = vld [vmem:[%s4300_s2 + $0x30] sm:$0xff]   ;;  %v2720_v50 = vld [vmem:[%s4300_s2 + $0x18] sm:$0xff]  }
 0x124   : > { %v1283_v16 = vsub.f32 %v4802_v39, %v1107_v40  ;;  %v2706_v26 = vpack.i.bf16 %v1786_v62, %v738_v58  ;;  %v1284_v47 = vsub.f32 %v4803_v30, %v1108_v34  ;;  %v1285_v31 = vsub.f32 %v4804_v20, %v1109_v61  ;;  %v2719_v62 = vld [vmem:[%s4300_s2 + $0x20] sm:$0xff]   ;;  %v2729_v39 = vld [vmem:[%s4302_s4 + $0x30] sm:$0xff]   ;;  %v2724_v20 = vld [vmem:[%s4300_s2 + $0x58] sm:$0xff]  }
 0x125   : > { %v1286_v38 = vsub.f32 %v4805_v0, %v1110_v10  ;;  %v1287_v1 = vsub.f32 %v4806_v24, %v1111_v9  ;;  %v1288_v54 = vsub.f32 %v4807_v18, %v1112_v19  ;;  %v1289_v49 = vsub.f32 %v4808_v8, %v1113_v36  ;;  %v2718_v19 = vld [vmem:[%s4300_s2 + $0x28] sm:$0xff]   ;;  %v2721_v36 = vld [vmem:[%s4300_s2 + $0x10] sm:$0xff]   ;;  %v2723_v30 = vld [vmem:[%s4300_s2] sm:$0xff]   ;;  %v4125_v0 = vpop.permute.xlu0 %2642  ;;  %v4143_v8 = vpop.permute.xlu1 %2647 }
 0x126   : > { %2707 = vrot.lane.b32.xlu0 %v2706_v26, %s2811_s15  ;;  %v1291_v14 = vmul.f32 0.083333336, %v1283_v16  ;;  %v1292_v63 = vmul.f32 0.083333336, %v1284_v47  ;;  %v1293_v2 = vmul.f32 0.083333336, %v1285_v31  ;;  %v1282_v45 = vsub.f32 %v4809_v21, %v1106_v53 }
 0x127   : > { %v1294_v33 = vmul.f32 0.083333336, %v1286_v38  ;;  %v1295_v12 = vmul.f32 0.083333336, %v1287_v1  ;;  %v1296_v22 = vmul.f32 0.083333336, %v1288_v54 }
 0x128   : > { %v1297_v58 = vmul.f32 0.083333336, %v1289_v49  ;;  %v1801_v5 = vrot.slane %v1291_v14, 7  ;;  %v1802_v15 = vrot.slane %v1292_v63, 6  ;;  %v1804_v52 = vrot.slane %v1293_v2, 5  ;;  %v2728_v53 = vld [vmem:[%s4302_s4 + $0x38] sm:$0xff]  }
 0x129   : > { %v1806_v60 = vrot.slane %v1294_v33, 4  ;;  %v1808_v55 = vrot.slane %v1295_v12, 3  ;;  %v1810_v44 = vrot.slane %v1296_v22, 2  ;;  %v1290_v34 = vmul.f32 0.083333336, %v1282_v45  ;;  %v2722_v16 = vld [vmem:[%s4300_s2 + $0x8] sm:$0xff]   ;;  %v4137_v18 = vpop.permute.xlu0 %2652  ;;  %v4148_v63 = vpop.permute.xlu1 %2657 }
 0x12a   : > { %v1803_v37 = vsel %vm1396_vm1, %v1802_v15, %v1801_v5  ;;  %v1812_v41 = vrot.slane %v1297_v58, 1  ;;  %v2813_v9 = vmov 0   ;;  %v2814_v6 = vmov 0.0   ;;  %v2730_v26 = vld [vmem:[%s4302_s4 + $0x28] sm:$0xff]   ;;  %v2731_v47 = vld [vmem:[%s4302_s4 + $0x20] sm:$0xff]   ;;  %v2732_v31 = vld [vmem:[%s4302_s4 + $0x18] sm:$0xff]  }
 0x12b   : > { %v1805_v40 = vsel %vm1399_vm2, %v1804_v52, %v1803_v37  ;;  %2198 = vmatprep.subr.bf16.mxu0 %v2813_v9  ;;  %2564 = vmatprep.subr.bf16.mxu1 %v2814_v6  ;;  %v2725_v38 = vld [vmem:[%s4300_s2 + $0x50] sm:$0xff]   ;;  %v2726_v1 = vld [vmem:[%s4300_s2 + $0x48] sm:$0xff]   ;;  %v2727_v54 = vld [vmem:[%s4300_s2 + $0x40] sm:$0xff]   ;;  %v755_v14 = vrot.slane %v4770_v59, 7  ;;  %v756_v2 = vrot.slane %v4771_v35, 7  ;;  %v754_v21 = vrot.slane %v4775_v43, 7 }
 0x12c   : > { %v1807_v42 = vsel %vm1402_vm3, %v1806_v60, %v1805_v40  ;;  %2199 = vmatpush1.bf16.msra.mxu0 %v2716_v48  ;;  %2565 = vmatpush3.bf16.msra.mxu1 %v2728_v53  ;;  %v2733_v24 = vld [vmem:[%s4302_s4 + $0x10] sm:$0xff]   ;;  %v4810_v33 = vld [vmem:[#allocation19_spill] sm:$0xff]  ;;  %v757_v22 = vrot.slane %v4772_v7, 7  ;;  %v4811_v58 = vld [vmem:[#allocation96_spill] sm:$0xff]  ;;  %v758_v43 = vrot.slane %v4773_v32, 7  ;;  %s2441_s15 = sshll.u32 %s263_s14, 3 }
 0x12d   : > { %v1809_v61 = vsel %vm1405_vm4, %v1808_v55, %v1807_v42  ;;  %2200 = vmatprep.subr.bf16.mxu0 %v2813_v9  ;;  %2566 = vmatprep.subr.bf16.mxu1 %v2814_v6  ;;  %v4145_v49 = vpop.permute.xlu0 %2035  ;;  %v771_v12 = vsub.f32 %v4810_v33, %v755_v14  ;;  %v563_v5 = vsub.f32 %v4778_v56, %v4811_v58  ;;  %v4812_v15 = vld [vmem:[#allocation97_spill] sm:$0xff]  ;;  %v4813_v60 = vld [vmem:[#allocation116_spill] sm:$0xff]  ;;  %v4814_v55 = vld [vmem:[#allocation111_spill] sm:$0xff]  ;;  %s265_s19 = scalar_lea.vmem [#allocation2], %s2441_s15 }
 0x12e   : > { %v1811_v57 = vsel %vm1408_vm5, %v1810_v44, %v1809_v61  ;;  %v564_v52 = vsub.f32 %v4779_v4, %v4812_v15  ;;  %v772_v59 = vsub.f32 %v4813_v60, %v756_v2  ;;  %v770_v37 = vsub.f32 %v4814_v55, %v754_v21  ;;  %v4162_v44 = vpop.permute.xlu1 %2662  ;;  %v4815_v40 = vld [vmem:[#allocation98_spill] sm:$0xff]  ;;  %v4816_v7 = vld [vmem:[#allocation117_spill] sm:$0xff]  ;;  %v4817_v48 = vld [vmem:[#allocation99_spill] sm:$0xff]  ;;  %s2366_s20 = sshll.u32 %s265_s19, 4  ;;  %s4259_s20 = int_to_ptr.vmem [resolvable:$true] %s2366_s20 }
 0x12f   : > { %v1813_v27 = vsel %vm1411_vm6, %v1812_v41, %v1811_v57  ;;  %v779_v35 = vmul.f32 0.083333336, %v771_v12  ;;  %v565_v41 = vsub.f32 %v4780_v13, %v4815_v40  ;;  %v773_v42 = vsub.f32 %v4816_v7, %v757_v22  ;;  %v4822_v2 = vld [vmem:[#allocation46_spill] sm:$0xff]  ;;  %v4824_v60 = vld [vmem:[#allocation48_spill] sm:$0xff]  ;;  %s2736_s10 = scalar_lea.vmem %s4259_s20, 128 }
 0x130   : > { %v2711_v10 = vpack.i.bf16 %v1813_v27, %v1290_v34  ;;  %2201 = vmatpush1.bf16.msra.mxu0 %v2717_v46  ;;  %2567 = vmatpush3.bf16.msra.mxu1 %v2729_v39  ;;  %v571_v56 = vmul.f32 0.071428575, %v563_v5  ;;  %v572_v61 = vmul.f32 0.071428575, %v564_v52  ;;  %v780_v57 = vmul.f32 0.083333336, %v772_v59  ;;  %p2737_p11 = scmp.ne.s32.totalorder %s4259_s20, %s2736_s10 }
 0x131   : > { %2202 = vmatprep.subr.bf16.mxu0 %v2813_v9  ;;  %2568 = vmatprep.subr.bf16.mxu1 %v2814_v6  ;;  %v4152_v45 = vpop.permute.xlu0 %2060  ;;  %v778_v4 = vmul.f32 0.083333336, %v770_v37  ;;  %v759_v27 = vrot.slane %v4774_v29, 7  ;;  %v4818_v46 = vld [vmem:[#allocation118_spill] sm:$0xff]  ;;  %v573_v32 = vmul.f32 0.071428575, %v565_v41 }
 0x132   : > { %2712 = vrot.lane.b32.xlu1 %v2711_v10, %s2812_s18  ;;  %v1872_v10 = vrot.slane %v779_v35, 7  ;;  %v781_v13 = vmul.f32 0.083333336, %v773_v42  ;;  %v1395_v53 = vrot.slane %v572_v61, 6  ;;  %v1874_v39 = vrot.slane %v780_v57, 6  ;;  %v4823_v15 = vld [vmem:[#allocation102_spill] sm:$0xff]  ;;  %p2738_p12 = pnand %p2737_p11, %p2890_p5 }
 0x133   : > { %v569_v52 = vsub.f32 %v4784_v51, %v4823_v15  ;;  %s2472_s18 = sshll.u32 %s2873_s25, 7  ;;  %s2816_s25 = smov [#allocation2]  }
 0x134   : > { %2203 = vmatpush1.bf16.msra.mxu0 %v2718_v19  ;;  %2569 = vmatpush3.bf16.msra.mxu1 %v2730_v26  ;;  %v774_v19 = vsub.f32 %v4818_v46, %v758_v43  ;;  %s4257_s29 = scalar_lea.hbm %s4304_s6, %s2472_s18  ;;  %p2739_p13 = pneg %p2738_p12 }
 0x135   : > { %2204 = vmatprep.subr.bf16.mxu0 %v2813_v9  ;;  %2570 = vmatprep.subr.bf16.mxu1 %v2814_v6  ;;  %v577_v42 = vmul.f32 0.071428575, %v569_v52  ;;  %v2655_v52 = vunpack.i.h.bf16 %v4137_v18  ;;  %s2740_s11 = sshll.u32 %s2816_s25, 4  ;;  %s2741_s11 = int_to_ptr.vmem [resolvable:$false] %s2740_s11 }
 0x136   : > { %s2742_s12 = scalar_lea.vmem %s2741_s11, 256  ;;  %p2743_p0 = scmp.lt.s32.totalorder %s4259_s20, %s2741_s11 }
 0x137   : > { %v1410_v46 = vrot.slane %v577_v42, 1  ;;  %v2664_v42 = vunpack.i.l.bf16 %v4162_v44  ;;  %p2744_p1 = scmp.lt.s32.totalorder %s2742_s12, %s2736_s10 }
 0x138   : > { %2205 = vmatpush1.bf16.msra.mxu0 %v2719_v62  ;;  %2571 = vmatpush3.bf16.msra.mxu1 %v2731_v47  ;;  %v4174_v62 = vpop.permute.xlu1 %2667  ;;  %v1873_v47 = vsel %vm1396_vm1, %v1872_v10, %v778_v4 }
 0x139   : > { %2206 = vmatprep.subr.bf16.mxu0 %v2813_v9  ;;  %2572 = vmatprep.subr.bf16.mxu1 %v2814_v6  ;;  %p2745_p2 = por %p2744_p1, %p2743_p0 }
 0x13b   : > { %v4167_v34 = vpop.permute.xlu0 %2677  ;;  %p2746_p3 = pnand %p2745_p2, %p2739_p13 }
 0x13c   : > { %2207 = vmatpush1.bf16.msra.mxu0 %v2720_v50  ;;  %2573 = vmatpush3.bf16.msra.mxu1 %v2732_v31  ;;  %v1394_v50 = vrot.slane %v571_v56, 7  ;;  %v782_v31 = vmul.f32 0.083333336, %v774_v19  ;;  %v4187_v12 = vpop.permute.xlu1 %2672 }
 0x13d   : > { %2208 = vmatprep.subr.bf16.mxu0 %v2813_v9  ;;  %2574 = vmatprep.subr.bf16.mxu1 %v2814_v6 }
 0x13e   : > { %v1878_v5 = vrot.slane %v782_v31, 4 }
 0x140   : > { %2209 = vmatpush1.bf16.msra.mxu0 %v2721_v36  ;;  %2575 = vmatpush3.bf16.msra.mxu1 %v2733_v24  ;;  %v760_v36 = vrot.slane %v4776_v25, 7  ;;  %v761_v24 = vrot.slane %v4777_v11, 7  ;;  %v1397_v25 = vsel %vm1396_vm1, %v1395_v53, %v1394_v50  ;;  %v2645_v53 = vunpack.i.h.bf16 %v4125_v0 }
 0x141   : > { %2210 = vmatprep.subr.bf16.mxu0 %v2813_v9  ;;  %2576 = vmatprep.subr.bf16.mxu1 %v2814_v6  ;;  %vm1849_vm1 = vcmask 719872  }
 0x142   : > { %v776_v21 = vsub.f32 %v4822_v2, %v760_v36  ;;  %v777_v59 = vsub.f32 %v4824_v60, %v761_v24  ;;  %v2644_v36 = vunpack.i.l.bf16 %v4125_v0 }
 0x144   : > { %2211 = vmatpush1.bf16.msra.mxu0 %v2722_v16  ;;  %v4819_v16 = vld [vmem:[#allocation100_spill] sm:$0xff]  ;;  %v784_v35 = vmul.f32 0.083333336, %v776_v21  ;;  %v2683_v56 = vpop.permute.xlu1 %2682  ;;  %v785_v61 = vmul.f32 0.083333336, %v777_v59  ;;  %v2650_v21 = vunpack.i.h.bf16 %v4143_v8 }
 0x145   : > { %2212 = vmatprep.subr.bf16.mxu0 %v2813_v9  ;;  %v567_v26 = vsub.f32 %v4782_v23, %v4819_v16  ;;  %v1875_v23 = vsel %vm1399_vm2, %v1874_v39, %v1873_v47  ;;  %v2685_v47 = vunpack.i.h.bf16 %v2683_v56 }
 0x146   : > { %v1882_v51 = vrot.slane %v784_v35, 2  ;;  %v1884_v19 = vrot.slane %v785_v61, 1  ;;  %v2659_v35 = vunpack.i.l.bf16 %v4148_v63 }
 0x147   : > { %v575_v33 = vmul.f32 0.071428575, %v567_v26  ;;  %v2680_v26 = vunpack.i.h.bf16 %v4167_v34 }
 0x148   : > { %2213 = vmatpush1.bf16.msra.mxu0 %v2723_v30  ;;  %v4820_v30 = vld [vmem:[#allocation44_spill] sm:$0xff] }
 0x149   : > { %2222 = vmatprep.subr.bf16.mxu0 %v2813_v9  ;;  %v775_v29 = vsub.f32 %v4820_v30, %v759_v27  ;;  %v1404_v43 = vrot.slane %v575_v33, 3  ;;  %v2679_v30 = vunpack.i.l.bf16 %v4167_v34 }
 0x14b   : > { %v783_v22 = vmul.f32 0.083333336, %v775_v29 }
 0x14c   : > { %2223 = vmatpush2.bf16.msra.mxu0 %v2724_v20 }
 0x14d   : > { %2224 = vmatprep.subr.bf16.mxu0 %v2813_v9  ;;  %v1911_v20 = vpop.permute.xlu0 %1910  ;;  %v1880_v40 = vrot.slane %v783_v22, 3 }
 0x150   : > { %2225 = vmatpush2.bf16.msra.mxu0 %v2725_v38  ;;  %v1398_v38 = vrot.slane %v573_v32, 5 }
 0x151   : > { %2226 = vmatprep.subr.bf16.mxu0 %v2813_v9 }
 0x152   : > { %v1400_v11 = vsel %vm1399_vm2, %v1398_v38, %v1397_v25  ;;  %vm1852_vm2 = vcmask 785408  }
 0x154   : > { %2227 = vmatpush2.bf16.msra.mxu0 %v2726_v1  ;;  %v1876_v1 = vrot.slane %v781_v13, 5 }
 0x155   : > { %2228 = vmatprep.subr.bf16.mxu0 %v2813_v9  ;;  %v566_v9 = vsub.f32 %v4781_v17, %v4817_v48  ;;  %v4825_v48 = vld [vmem:[#allocation95_spill] sm:$0xff] }
 0x157   : > { %v574_v17 = vmul.f32 0.071428575, %v566_v9  ;;  %v562_v9 = vsub.f32 %v4785_v28, %v4825_v48 }
 0x158   : > { %2229 = vmatpush2.bf16.msra.mxu0 %v2727_v54  ;;  %v4821_v54 = vld [vmem:[#allocation101_spill] sm:$0xff]  ;;  %v4202_v50 = vpop.permute.xlu1 %2687 }
 0x159   : > { %v568_v14 = vsub.f32 %v4783_v3, %v4821_v54  ;;  %v1401_v58 = vrot.slane %v574_v17, 4  ;;  %v1877_v3 = vsel %vm1402_vm3, %v1876_v1, %v1875_v23  ;;  %v570_v39 = vmul.f32 0.071428575, %v562_v9 }
 0x15a   : > { %v1879_v7 = vsel %vm1405_vm4, %v1878_v5, %v1877_v3  ;;  %v2684_v17 = vunpack.i.l.bf16 %v2683_v56  ;;  %v2649_v23 = vunpack.i.l.bf16 %v4143_v8  ;;  %v2689_v56 = vunpack.i.l.bf16 %v4202_v50 }
 0x15b   : > { %v576_v37 = vmul.f32 0.071428575, %v568_v14  ;;  %v1403_v41 = vsel %vm1402_vm3, %v1401_v58, %v1400_v11  ;;  %v1881_v27 = vsel %vm1408_vm5, %v1880_v40, %v1879_v7  ;;  %v1820_v31 = vsel %vm313_vm0, %v570_v39, %v2644_v36 }
 0x15c   : > { %v1406_v4 = vsel %vm1405_vm4, %v1404_v43, %v1403_v41  ;;  %v1883_v13 = vsel %vm1411_vm6, %v1882_v51, %v1881_v27  ;;  %v1823_v24 = vsel %vm1822_vm8, %v1820_v31, %v2679_v30  ;;  %v2654_v11 = vunpack.i.l.bf16 %v4137_v18 }
 0x15d   : > { %v1936_v55 = vpop.permute.xlu0 %1935  ;;  %v1407_v57 = vrot.slane %v576_v37, 2  ;;  %v1886_v28 = vsel %vm1885_vm7, %v1884_v19, %v1883_v13  ;;  %v1826_v25 = vsel %vm1825_vm9, %v1823_v24, %v2684_v17  ;;  %v2660_v37 = vunpack.i.h.bf16 %v4148_v63 }
 0x15e   : > { %v2063_v0 = vsel %vm313_vm0, %v1886_v28, %v1911_v20  ;;  %v1829_v5 = vsel %vm1828_vm10, %v1826_v25, %v2649_v23  ;;  %v2665_v18 = vunpack.i.h.bf16 %v4162_v44  ;;  %v2670_v30 = vunpack.i.h.bf16 %v4174_v62 }
 0x15f   : > { %v1409_v32 = vsel %vm1408_vm5, %v1407_v57, %v1406_v4  ;;  %v2064_v54 = vsel %vm1822_vm8, %v2063_v0, %v1936_v55  ;;  %v1832_v3 = vsel %vm1831_vm11, %v1829_v5, %v2654_v11  ;;  %v2669_v28 = vunpack.i.l.bf16 %v4174_v62  ;;  %v2448_v11 = vld [vmem:[%s4301_s3] ss:$0 sm:$0xff] }
 0x160   : > { %v1412_v16 = vsel %vm1411_vm6, %v1410_v46, %v1409_v32  ;;  %v1835_v40 = vsel %vm1834_vm12, %v1832_v3, %v2659_v35  ;;  %vm1855_vm3 = vcmask 850944   ;;  %v2675_v31 = vunpack.i.h.bf16 %v4187_v12 }
 0x161   : > { %v1821_v38 = vsel %vm313_vm0, %v1412_v16, %v2645_v53  ;;  %v1838_v27 = vsel %vm1837_vm13, %v1835_v40, %v2664_v42  ;;  %vm1846_vm0 = vcmask 654336   ;;  %vm1858_vm4 = vcmask 916480  }
 0x162   : > { %v1824_v1 = vsel %vm1822_vm8, %v1821_v38, %v2680_v26  ;;  %v1841_v32 = vsel %vm1840_vm14, %v1838_v27, %v2689_v56  ;;  %v2674_v38 = vunpack.i.l.bf16 %v4187_v12  ;;  %vm1861_vm5 = vcmask 982016   ;;  %v2734_v12 = vld [vmem:[%s4302_s4 + $0x8] sm:$0xff]  }
 0x163   : > { %v1827_v2 = vsel %vm1825_vm9, %v1824_v1, %v2685_v47  ;;  %2577 = vmatpush3.bf16.msra.mxu1 %v2734_v12  ;;  %vm2815_vm6 = vmmov 0  }
 0x164   : > { %v1830_v15 = vsel %vm1828_vm10, %v1827_v2, %v2650_v21  ;;  %2578 = vmatprep.subr.bf16.mxu1 %v2814_v6  ;;  %2580 = vmatprep.mubr.msk.bf16.mxu1 %vm2815_vm6, %v2814_v6 }
 0x165   : > { %v1833_v55 = vsel %vm1831_vm11, %v1830_v15, %v2655_v52  ;;  %v2735_v52 = vld [vmem:[%s4302_s4] sm:$0xff]  }
 0x167   : > { %2579 = vmatpush3.bf16.msra.mxu1 %v2735_v52 }
 0x169   : > { %v2693_v14 = vpop.permute.xlu1 %2692 }
 0x16a   : > { %v2695_v63 = vunpack.i.h.bf16 %v2693_v14  ;;  %v2694_v4 = vunpack.i.l.bf16 %v2693_v14 }
 0x16e   : > { %v1961_v10 = vpop.permute.xlu0 %1960 }
 0x16f   : > { %v2065_v34 = vsel %vm1825_vm9, %v2064_v54, %v1961_v10 }
 0x177   : > { %v2698_v59 = vpop.permute.xlu1 %2697 }
 0x178   : > { %v2700_v48 = vunpack.i.h.bf16 %v2698_v59  ;;  %v2699_v9 = vunpack.i.l.bf16 %v2698_v59 }
 0x17d   : > { %v1986_v29 = vpop.permute.xlu0 %1985 }
 0x17e   : > { %v2066_v33 = vsel %vm1828_vm10, %v2065_v34, %v1986_v29 }
 0x186   : > { %v2703_v61 = vpop.permute.xlu1 %2702 }
 0x187   : > { %v2705_v19 = vunpack.i.h.bf16 %v2703_v61  ;;  %v2704_v44 = vunpack.i.l.bf16 %v2703_v61 }
 0x18b   : > { %v2011_v22 = vpop.permute.xlu0 %2010 }
 0x18c   : > { %v2067_v58 = vsel %vm1831_vm11, %v2066_v33, %v2011_v22 }
 0x18d   : > { %v2068_v20 = vsel %vm1834_vm12, %v2067_v58, %v4145_v49  ;;  %v1836_v49 = vsel %vm1834_vm12, %v1833_v55, %v2660_v37 }
 0x18e   : > { %v2069_v60 = vsel %vm1837_vm13, %v2068_v20, %v4152_v45  ;;  %v2690_v45 = vunpack.i.h.bf16 %v4202_v50  ;;  %v1839_v10 = vsel %vm1837_vm13, %v1836_v49, %v2665_v18  ;;  %v1844_v50 = vsel %vm1843_vm15, %v1841_v32, %v2694_v4 }
 0x18f   : > { %v2071_v8 = vrot.slane %v2069_v60, 1  ;;  %v1847_v36 = vsel %vm1846_vm0, %v1844_v50, %v2699_v9 }
 0x190   : > { %v1842_v13 = vsel %vm1840_vm14, %v1839_v10, %v2690_v45  ;;  %v1850_v16 = vsel %vm1849_vm1, %v1847_v36, %v2704_v44 }
 0x191   : > { %v2074_v43 = vpack.c.bf16 %v2071_v8, %v2071_v8  ;;  %v1845_v53 = vsel %vm1843_vm15, %v1842_v13, %v2695_v63  ;;  %v1853_v47 = vsel %vm1852_vm2, %v1850_v16, %v2669_v28 }
 0x192   : > { %v1848_v39 = vsel %vm1846_vm0, %v1845_v53, %v2700_v48  ;;  %v1856_v1 = vsel %vm1855_vm3, %v1853_v47, %v2674_v38 }
 0x193   : > { %v2115_v41 = vshrl.u32 %v2074_v43, 16  ;;  %v2118_v7 = vshll.u32 %v2074_v43, 16  ;;  %v1851_v26 = vsel %vm1849_vm1, %v1848_v39, %v2705_v19  ;;  %v2462_v43 = vld [vmem:[%s4303_s5] ss:$0 sm:$0xff] }
 0x194   : > { %v1854_v17 = vsel %vm1852_vm2, %v1851_v26, %v2670_v30 }
 0x195   : > { %v2117_v57 = vrot.slane %v2115_v41, 3  ;;  %v2120_v51 = vrot.slane %v2118_v7, 4  ;;  %v1857_v54 = vsel %vm1855_vm3, %v1854_v17, %v2675_v31 }
 0x197   : > { %v2121_v46 = vor.u32 %v2120_v51, %v2117_v57 }
 0x198   : > { %v2708_v29 = vpop.permute.xlu0 %2707 }
 0x199   : > { %2461 = vmatprep.mubr.msk.bf16.mxu0 %vm1840_vm14, %v2121_v46  ;;  %v2710_v0 = vunpack.i.h.bf16 %v2708_v29  ;;  %v2709_v24 = vunpack.i.l.bf16 %v2708_v29 }
 0x19b   : > { %v1859_v25 = vsel %vm1858_vm4, %v1856_v1, %v2709_v24  ;;  %v1860_v2 = vsel %vm1858_vm4, %v1857_v54, %v2710_v0 }
 0x1a4   : > { %v2713_v14 = vpop.permute.xlu1 %2712 }
 0x1a5   : > { %v2715_v34 = vunpack.i.h.bf16 %v2713_v14  ;;  %v2714_v21 = vunpack.i.l.bf16 %v2713_v14 }
 0x1a7   : > { %v1862_v62 = vsel %vm1861_vm5, %v1859_v25, %v2714_v21  ;;  %v1863_v23 = vsel %vm1861_vm5, %v1860_v2, %v2715_v34 }
 0x1a8   : > { %v2073_v33 = vpack.c.bf16 %v1863_v23, %v1862_v62 }
 0x1aa   : > { %v2107_v22 = vshrl.u32 %v2073_v33, 16  ;;  %v2110_v58 = vshll.u32 %v2073_v33, 16 }
 0x1ac   : > { %v2109_v5 = vrot.slane %v2107_v22, 3  ;;  %v2112_v15 = vrot.slane %v2110_v58, 4 }
 0x1ae   : > { %v2113_v20 = vor.u32 %v2112_v15, %v2109_v5 }
 0x1b0   : > { %2231 = vmatmul.mubr.bf16.vlgmr.msra.gmra.mxu0 %v2113_v20 }
 0x270   : > { %v2232_v60 = vpop.f32.mrf.mxu0 }
 0x271   : > { %v2233_v59 = vadd.f32 %v2448_v11, %v2232_v60 }
 0x272   : > { %v2234_v8 = vpop.f32.mrf.mxu0 }
 0x273   : > { %v2238_v3 = vmax.f32 %v2233_v59, 0.0 }
 0x274   : > { %v2235_v55 = vpop.f32.mrf.mxu0 }
 0x275   : > { %v2239_v37 = vpack.c.bf16 %v2238_v3, %v2238_v3 }
 0x276   : > { %v2236_v35 = vpop.f32.mrf.mxu0 }
 0x277   : > { %2581 = vmatmul.mubr.bf16.vlgmr.msra.gmra.mxu1 %v2239_v37 }
 0x337   : > { %v2345_v6 = vpop.f32.mrf.mxu1 }
 0x338   : > { %v2346_v40 = vadd.f32 %v2462_v43, %v2345_v6 }
 0x339   : > { %v2582_v49 = vpop.f32.mrf.mxu1 }
 0x33a   : > { %2351 = vst [vmem:[%s265_s19] sm:$0xff] %v2346_v40 }
 0x33b   : > { %v2348_v41 = vpop.f32.mrf.mxu1 }
 0x33c   : > { %2749 = shalt.err (!%p2746_p3)
}
 0x33d   : > { %s2750_s13 = scalar_lea.hbm %s4257_s29, 128  ;;  %s2754_s16 = scalar_lea.hbm %s4304_s6, 256 }
 0x33e   : > { %p2751_p4 = scmp.ne.s32.totalorder %s4257_s29, %s2750_s13  ;;  %p2755_p9 = scmp.lt.s32.totalorder %s4257_s29, %s4304_s6 }
 0x33f   : > { %p2756_p10 = scmp.lt.s32.totalorder %s2754_s16, %s2750_s13 }
 0x340   : > { %p2752_p7 = pnand %p2751_p4, %p2890_p5 }
 0x341   : > { %p2757_p11 = por %p2756_p10, %p2755_p9 }
 0x342   : > { %p2753_p8 = pneg %p2752_p7 }
 0x344   : > { %p2758_p12 = pnand %p2757_p11, %p2753_p8 }
 0x346   : > { %2761 = shalt.err (!%p2758_p12)
}
 0x347   : > { %2584 = dma.vmem_to_hbm [thread:$0]  (%p2890_p5), %s4259_s20, 128, %s4257_s29, %s2353_s9   ;;  %v2583_v7 = vpop.f32.mrf.mxu1 }
 0x348 PF: > { %p2590_p13 = scmp.ge.s32.totalorder %s2796_s24, 2  ;;  %s2378_s19 = sand.u32 1, %s2784_s21  }
 0x349   : > { %s2379_s26 = scalar_lea.sflag [#allocation3], %s2378_s19 }
 0x34a   : > { %p2587_p0 = pnand %p2590_p13, %p2894_p6 }
 0x34c   : > { %p2588_p1 = pneg %p2587_p0 }
 0x34e   : > { %2779 = dma.done.wait (%p2588_p1), %s2379_s26, 128  }
 0x34f   : > { %2781 = vsyncadd (%p2588_p1), %s2379_s26, 4294967168  ;;  %p16_p2 = scmp.ge.s32.totalorder %s2877_s27, 4   ;;  %s4826_s21 = smov %s2788_s22 }
 0x350   : > { %s4827_s22 = smov %s2792_s23  ;;  %s4828_s23 = smov %s2888_s30 }
 0x351   : > { %s4829_s24 = smov %s2877_s27  ;;  %18 = sbr.rel (!%p16_p2) target bundleno = 3 (0x3), region = 82 }
 0x356   :  { %2384 = vsyncpa [#allocation3], 1 }
 0x357   :  { %2386 = vsyncpa [#allocation3 + $0x1], 1 }

</bundles_post_ra>
